<compile_context>
chip_gen: v7x
topology: tpu7x:2x2x1
jax: 0.10.0
libtpu: 0.0.40
codegen_flags: <defaults>
</compile_context>

<pallas_src>
import functools

import jax
import jax.numpy as jnp
from jax import lax
from jax.experimental import pallas as pl
from jax.experimental.pallas import tpu as pltpu


def _attention_kernel(
    q_ref,      # [TB*Q, Cq]          compute dtype
    k_ref,      # [TB*K, Ck]          compute dtype
    v_ref,      # [TB*K, Cv]          compute dtype
    mask_ref,   # [TBm, 1, K]         additive, bf16/f32 transport
    bias_ref,   # [TBb, H, Q, K]      additive, bf16/f32 transport
    wqg_ref,    # [Cq, 2*H*D]         fused (Wq*norm | Wg), compute dtype
    wk_ref,     # [Ck, H*D]
    wv_ref,     # [Cv, H*D]
    bg_ref,     # [1, H*D]            f32
    wo_ref,     # [H*D, Cq]
    out_ref,    # [TB*Q, Cq]
    qp_ref,     # VMEM scratch [TB*Q, H*D]  compute dtype
    kp_ref,     # VMEM scratch [TB*K, H*D]  compute dtype
    vp_ref,     # VMEM scratch [TB*K, H*D]  compute dtype
    g_ref,      # VMEM scratch [TB*Q, H*D]  f32 (sigmoid gate)
    og_ref,     # VMEM scratch [TB*Q, H*D]  compute dtype (gated head outputs)
    *,
    num_heads,
    head_dim,
    batch_block,
    q_len,
    k_len,
    mask_per_batch,
    bias_per_batch,
    approx_recip,
):
    f32 = jnp.float32
    H, D = num_heads, head_dim
    HD = H * D
    TB, Qn, Kn = batch_block, q_len, k_len
    cdt = qp_ref.dtype

    # --- projections: casts to the MXU operand dtype hoisted here (once per step) ---
    qg = jnp.dot(q_ref[...], wqg_ref[...], preferred_element_type=f32)   # [TB*Q, 2HD]
    qp_ref[...] = qg[:, :HD].astype(cdt)                  # norm already folded into Wq
    g_ref[...] = jax.nn.sigmoid(qg[:, HD:] + bg_ref[...])
    kp_ref[...] = jnp.dot(k_ref[...], wk_ref[...],
                          preferred_element_type=f32).astype(cdt)
    vp_ref[...] = jnp.dot(v_ref[...], wv_ref[...],
                          preferred_element_type=f32).astype(cdt)

    # Batch-broadcast mask is loaded once, outside the batch loop.
    m_const = None if mask_per_batch else mask_ref[0].astype(f32)        # [1, K]

    def batch_body(b, carry):
        qrow = b * Qn
        krow = b * Kn
        if Qn % 8 == 0:
            qrow = pl.multiple_of(qrow, 8)
        if Kn % 8 == 0:
            krow = pl.multiple_of(krow, 8)
        q_b = qp_ref[pl.ds(qrow, Qn), :]                  # [Q, HD] cdt
        k_b = kp_ref[pl.ds(krow, Kn), :]                  # [K, HD] cdt
        v_b = vp_ref[pl.ds(krow, Kn), :]                  # [K, HD] cdt
        g_b = g_ref[pl.ds(qrow, Qn), :]                   # [Q, HD] f32
        m_b = mask_ref[b].astype(f32) if mask_per_batch else m_const
        bidx = b if bias_per_batch else 0

        # Static head loop (static lane slices); head h+1's QK^T / PV MXU pushes can
        # overlap head h's softmax VALU/EUP work.
        heads = []
        for h in range(H):
            lo = h * D
            s = jnp.einsum("qd,kd->qk", q_b[:, lo:lo + D], k_b[:, lo:lo + D],
                           preferred_element_type=f32)    # [Q, K] f32
            s = s + m_b + bias_ref[bidx, h].astype(f32)
            s = s - jnp.max(s, axis=-1, keepdims=True)
            e = jnp.exp(s)
            denom = jnp.sum(e, axis=-1, keepdims=True)
            if approx_recip:
                p = e * pl.reciprocal(denom, approx=True)  # EUP slot, frees VALU
            else:
                p = e / denom                              # exact (f32 self-test)
            heads.append(jnp.dot(p.astype(cdt), v_b[:, lo:lo + D],
                                 preferred_element_type=f32))            # [Q, D] f32

        # One full-width gate multiply + one unmasked lane-dense store per batch
        # element (instead of H masked D-lane stores / gate multiplies).
        o_b = jnp.concatenate(heads, axis=-1)             # [Q, HD] f32
        og_ref[pl.ds(qrow, Qn), :] = (g_b * o_b).astype(cdt)
        return carry

    lax.fori_loop(0, TB, batch_body, 0)

    # Single lane-dense output projection: [TB*Q, HD] @ [HD, Cq].
    out_ref[...] = jnp.dot(og_ref[...], wo_ref[...],
                           preferred_element_type=f32).astype(out_ref.dtype)


def prepare_attention_params(params, *, num_heads, head_dim, compute_dtype=None):
    """One-time weight prep: PyTorch [out,in] layout -> kernel layout.

    Folds norm=head_dim**-0.5 into Wq, fuses (Wq|Wg) into one wide weight, transposes
    to [in,out] and casts to the MXU compute dtype.  Call once per parameter set and
    pass the result to `attention` to avoid per-call prep.
    """
    f32 = jnp.float32
    H, D = num_heads, head_dim
    HD = H * D
    cdt = (jnp.dtype(compute_dtype) if compute_dtype is not None
           else jnp.dtype(params["wq"].dtype))
    norm = float(D) ** -0.5
    wq_t = (params["wq"].astype(f32) * norm).T             # [Cq, HD], norm folded
    wg_t = params["wg"].astype(f32).T                      # [Cq, HD]
    return {
        "wqg": jnp.concatenate([wq_t, wg_t], axis=-1).astype(cdt),   # [Cq, 2*HD]
        "wk": params["wk"].T.astype(cdt),                  # [Ck, HD]
        "wv": params["wv"].T.astype(cdt),                  # [Cv, HD]
        "bg": params["bg"].reshape(1, HD).astype(f32),     # [1, HD]
        "wo": params["wo"].T.astype(cdt),                  # [HD, Cq]
    }


def _vmem_budget_bytes():
    """Generation-aware VMEM budget: <=48 MiB on v7x (64 MiB/TC), up to 96 MiB on
    v5e/v6e (128 MiB)."""
    try:
        cap = int(pltpu.get_tpu_info().vmem_capacity_bytes)
    except Exception:
        cap = 64 * 1024 * 1024            # conservative default, fits every generation
    return min((3 * cap) // 4, 96 * 1024 * 1024)


def attention(q, k, v, mask, bias, params, *, num_heads, head_dim,
              batch_block=None, compute_dtype=None, approx_softmax_recip=None):
    """Pallas TPU implementation of unifold Attention.forward (gated, with attention).

    q: [B, Q, Cq], k: [B, K, Ck], v: [B, K, Cv]
    mask: additive mask broadcasting over heads/queries; batch dim may be 1 or B
          (e.g. [B,1,1,K], [1,1,1,K], [B,K], [K]) or None.
    bias: additive bias broadcastable to [Bb, H, Q, K] with Bb in {1, B} (a
          batch-broadcast pair bias stays unexpanded / VMEM-resident) or None.
    params: PyTorch-layout weights {wq,wk,wv,wg,bg,wo} or prepare_attention_params().
    """
    B, Qn, Cq = q.shape
    _, Kn, Ck = k.shape
    _, _, Cv = v.shape
    H, D = num_heads, head_dim
    HD = H * D
    f32 = jnp.float32
    out_dtype = q.dtype
    cdt = jnp.dtype(compute_dtype) if compute_dtype is not None else jnp.dtype(q.dtype)
    # Mask/bias transport dtype: bf16 on the bf16 compute path (halves the dominant
    # HBM stream); logit math stays f32 inside the kernel.
    lb_dtype = jnp.dtype(jnp.bfloat16) if cdt == jnp.dtype(jnp.bfloat16) else jnp.dtype(f32)
    approx_recip = (cdt == jnp.dtype(jnp.bfloat16)) if approx_softmax_recip is None \
        else bool(approx_softmax_recip)

    # ---- additive mask (unicore softmax_dropout semantics: logits += mask += bias).
    if mask is None:
        mask3 = jnp.zeros((1, 1, Kn), lb_dtype)
        mask_per_batch = False
    else:
        mask = jnp.asarray(mask)
        if mask.size == Kn:                                # broadcasts over batch too
            mask3 = mask.reshape(1, 1, Kn).astype(lb_dtype)
            mask_per_batch = False
        elif mask.size == B * Kn:
            mask3 = mask.reshape(B, 1, Kn).astype(lb_dtype)
            mask_per_batch = True
        else:
            raise ValueError("mask must broadcast over heads and query positions")

    # ---- additive bias; batch-broadcast bias stays unexpanded (DMA'd once).
    if bias is None:
        bias4 = jnp.zeros((1, H, Qn, Kn), lb_dtype)
        bias_per_batch = False
    else:
        bias = jnp.asarray(bias)
        bb = bias.shape[0] if bias.ndim == 4 else 1
        if bb not in (1, B):
            raise ValueError("bias batch dim must be 1 or B")
        bias4 = jnp.broadcast_to(bias, (bb, H, Qn, Kn)).astype(lb_dtype)
        bias_per_batch = (bb == B) and (B > 1)

    # ---- weights (prep once; accepts raw PyTorch-layout or prepared params).
    prep = params if "wqg" in params else prepare_attention_params(
        params, num_heads=H, head_dim=D, compute_dtype=cdt)
    wqg = jnp.asarray(prep["wqg"], cdt)
    wk_t = jnp.asarray(prep["wk"], cdt)
    wv_t = jnp.asarray(prep["wv"], cdt)
    wo_t = jnp.asarray(prep["wo"], cdt)
    bg = jnp.asarray(prep["bg"], f32).reshape(1, HD)

    # ---- batch tile: largest divisor of B whose per-step footprint fits the
    # generation-aware VMEM budget, preferring >=2 grid steps (feeds both v7x TCs)
    # and respecting the (8,128) block rule.
    budget = _vmem_budget_bytes()
    csz, osz, lsz = cdt.itemsize, jnp.dtype(out_dtype).itemsize, lb_dtype.itemsize

    def step_vmem_bytes(tb):
        tbm = tb if mask_per_batch else 1
        tbb = tb if bias_per_batch else 1
        io = 2 * tb * (Qn * Cq + Kn * Ck + Kn * Cv) * csz        # double-buffered q/k/v
        io += 2 * tb * Qn * Cq * osz                             # double-buffered out
        io += 2 * tbm * Kn * lsz + 2 * tbb * H * Qn * Kn * lsz   # mask / bias
        w = (Cq * 2 * HD + Ck * HD + Cv * HD + HD * Cq) * 2 * csz + HD * 4
        scr = tb * (Qn + 2 * Kn) * HD * csz + tb * Qn * HD * 4 + tb * Qn * HD * csz
        tmp = 6 * Qn * Kn * 4                                    # live f32 [Q,K] temps
        return io + w + scr + tmp

    def block_legal(tb):
        return tb == B or ((tb * Qn) % 8 == 0 and (tb * Kn) % 8 == 0)

    if batch_block is None:
        cands = [d for d in range(B, 0, -1) if B % d == 0]
        fitting = [tb for tb in cands
                   if block_legal(tb) and step_vmem_bytes(tb) <= int(0.8 * budget)]
        multi = [tb for tb in fitting if B // tb >= 2]
        if multi:
            TB = multi[0]
        elif fitting:
            TB = fitting[0]
        else:
            TB = next((tb for tb in cands if block_legal(tb)), B)
    else:
        TB = batch_block
    assert B % TB == 0, "batch_block must divide the batch size"
    assert block_legal(TB), "(TB*Q, TB*K) must be sublane(8)-aligned unless TB == B"

    # Flatten to 2-D slabs so DMAs and the output store are lane/sublane-dense.
    q2 = q.reshape(B * Qn, Cq).astype(cdt)
    k2 = k.reshape(B * Kn, Ck).astype(cdt)
    v2 = v.reshape(B * Kn, Cv).astype(cdt)

    kernel = functools.partial(
        _attention_kernel,
        num_heads=H, head_dim=D, batch_block=TB, q_len=Qn, k_len=Kn,
        mask_per_batch=mask_per_batch, bias_per_batch=bias_per_batch,
        approx_recip=approx_recip,
    )

    mask_spec = (pl.BlockSpec((TB, 1, Kn), lambda i: (i, 0, 0)) if mask_per_batch
                 else pl.BlockSpec((1, 1, Kn), lambda i: (0, 0, 0)))
    bias_spec = (pl.BlockSpec((TB, H, Qn, Kn), lambda i: (i, 0, 0, 0)) if bias_per_batch
                 else pl.BlockSpec((1, H, Qn, Kn), lambda i: (0, 0, 0, 0)))

    out2 = pl.pallas_call(
        kernel,
        out_shape=jax.ShapeDtypeStruct((B * Qn, Cq), out_dtype),
        grid_spec=pltpu.PrefetchScalarGridSpec(
            num_scalar_prefetch=0,
            grid=(B // TB,),
            in_specs=[
                pl.BlockSpec((TB * Qn, Cq), lambda i: (i, 0)),
                pl.BlockSpec((TB * Kn, Ck), lambda i: (i, 0)),
                pl.BlockSpec((TB * Kn, Cv), lambda i: (i, 0)),
                mask_spec,
                bias_spec,
                pl.BlockSpec((Cq, 2 * HD), lambda i: (0, 0)),
                pl.BlockSpec((Ck, HD), lambda i: (0, 0)),
                pl.BlockSpec((Cv, HD), lambda i: (0, 0)),
                pl.BlockSpec((1, HD), lambda i: (0, 0)),
                pl.BlockSpec((HD, Cq), lambda i: (0, 0)),
            ],
            out_specs=pl.BlockSpec((TB * Qn, Cq), lambda i: (i, 0)),
            scratch_shapes=[
                pltpu.VMEM((TB * Qn, HD), cdt),            # projected q
                pltpu.VMEM((TB * Kn, HD), cdt),            # projected k
                pltpu.VMEM((TB * Kn, HD), cdt),            # projected v
                pltpu.VMEM((TB * Qn, HD), jnp.float32),    # sigmoid gate
                pltpu.VMEM((TB * Qn, HD), cdt),            # gated head outputs
            ],
        ),
        compiler_params=pltpu.CompilerParams(
            dimension_semantics=("parallel",),
            vmem_limit_bytes=int(budget),
        ),
    )(q2, k2, v2, mask3, bias4, wqg, wk_t, wv_t, bg, wo_t)

    return out2.reshape(B, Qn, Cq)


def attention_reference(q, k, v, mask, bias, params, *, num_heads, head_dim):
    """Pure-JAX reference mirroring the PyTorch forward exactly."""
    H, D = num_heads, head_dim
    norm = D ** (-0.5)
    B, Qn, _ = q.shape
    Kn = k.shape[1]
    g = jax.nn.sigmoid(q @ params["wg"].T + params["bg"])        # [B, Q, HD]
    vp = v @ params["wv"].T                                      # [B, K, HD]
    qp = (q @ params["wq"].T) * norm
    kp = k @ params["wk"].T
    qh = qp.reshape(B, Qn, H, D).transpose(0, 2, 1, 3)           # [B, H, Q, D]
    kh = kp.reshape(B, Kn, H, D).transpose(0, 2, 1, 3)
    vh = vp.reshape(B, Kn, H, D).transpose(0, 2, 1, 3)
    attn = jnp.einsum("bhqd,bhkd->bhqk", qh, kh)
    if mask is not None:
        attn = attn + mask
    if bias is not None:
        attn = attn + bias
    attn = jax.nn.softmax(attn, axis=-1)                         # dropout p=0
    o = jnp.einsum("bhqk,bhkd->bhqd", attn, vh)
    o = o.transpose(0, 2, 1, 3).reshape(B, Qn, H * D)
    o = g * o
    return o @ params["wo"].T                                    # no output bias in forward()


if __name__ == "__main__":
    B, Qn, Kn = 2, 8, 8
    Cq = Ck = Cv = 32
    H, D = 4, 16
    HD = H * D

    key = jax.random.PRNGKey(0)
    keys = jax.random.split(key, 11)

    q = jax.random.normal(keys[0], (B, Qn, Cq), dtype=jnp.float32)
    k = jax.random.normal(keys[1], (B, Kn, Ck), dtype=jnp.float32)
    v = jax.random.normal(keys[2], (B, Kn, Cv), dtype=jnp.float32)
    keep = jax.random.uniform(keys[3], (B, 1, 1, Kn)) > 0.2
    mask = jnp.where(keep, 0.0, -1e9).astype(jnp.float32)        # additive mask
    bias = 0.1 * jax.random.normal(keys[4], (B, H, Qn, Kn), dtype=jnp.float32)

    # Deterministic synthetic parameters (PyTorch Linear layout: [out, in]).
    # TODO(synk): real init schemes are glorot/gating/final; only shapes matter here.
    s = 0.1
    params = {
        "wq": s * jax.random.normal(keys[5], (HD, Cq), dtype=jnp.float32),
        "wk": s * jax.random.normal(keys[6], (HD, Ck), dtype=jnp.float32),
        "wv": s * jax.random.normal(keys[7], (HD, Cv), dtype=jnp.float32),
        "wg": s * jax.random.normal(keys[8], (HD, Cq), dtype=jnp.float32),
        "bg": s * jax.random.normal(keys[9], (HD,), dtype=jnp.float32),
        "wo": s * jax.random.normal(keys[10], (Cq, HD), dtype=jnp.float32),
    }

    # 1) f32 path, per-batch mask + per-batch bias (tight check, exact softmax divide).
    out = attention(q, k, v, mask, bias, params, num_heads=H, head_dim=D)
    out = jax.block_until_ready(out)
    ref = attention_reference(q, k, v, mask, bias, params, num_heads=H, head_dim=D)
    assert out.shape == (B, Qn, Cq)
    err = jnp.max(jnp.abs(out - ref))
    assert jnp.allclose(out, ref, rtol=2e-4, atol=2e-4), f"f32 max abs err = {err}"

    # 2) f32 path, batch-broadcast bias/mask (exercises the VMEM-resident constant
    #    bias block -- the UniFold pair-bias case).
    mask_bc, bias_bc = mask[:1], bias[:1]
    out_bc = attention(q, k, v, mask_bc, bias_bc, params, num_heads=H, head_dim=D)
    out_bc = jax.block_until_ready(out_bc)
    ref_bc = attention_reference(q, k, v, mask_bc, bias_bc, params,
                                 num_heads=H, head_dim=D)
    err_bc = jnp.max(jnp.abs(out_bc - ref_bc))
    assert jnp.allclose(out_bc, ref_bc, rtol=2e-4, atol=2e-4), (
        f"broadcast-bias max abs err = {err_bc}")

    # 3) bf16 production path: bf16 MXU operands, bf16 mask/bias transport, approx
    #    softmax reciprocal.  Compare against the f32 reference on bf16-rounded operands.
    out_bf16 = attention(q, k, v, mask, bias, params, num_heads=H, head_dim=D,
                         compute_dtype=jnp.bfloat16)
    out_bf16 = jax.block_until_ready(out_bf16)
    rd = lambda a: a.astype(jnp.bfloat16).astype(jnp.float32)
    params_rd = {n: (p if n == "bg" else rd(p)) for n, p in params.items()}
    ref_bf16 = attention_reference(rd(q), rd(k), rd(v), mask, bias, params_rd,
                                   num_heads=H, head_dim=D)
    err_bf = jnp.max(jnp.abs(out_bf16 - ref_bf16))
    assert jnp.allclose(out_bf16, ref_bf16, rtol=3e-2, atol=3e-2), (
        f"bf16 max abs err = {err_bf}")

    print("KERNEL_OK")
</pallas_src>

<mosaic_0001>
module attributes {stable_mosaic.version = 11 : i64} {
  func.func @_attention_kernel(%arg0: i32, %arg1: memref<8x32xf32, #tpu.memory_space<vmem>>, %arg2: memref<8x32xf32, #tpu.memory_space<vmem>>, %arg3: memref<8x32xf32, #tpu.memory_space<vmem>>, %arg4: memref<1x1x8xf32, #tpu.memory_space<vmem>>, %arg5: memref<1x4x8x8xf32, #tpu.memory_space<vmem>>, %arg6: memref<32x128xf32, #tpu.memory_space<vmem>>, %arg7: memref<32x64xf32, #tpu.memory_space<vmem>>, %arg8: memref<32x64xf32, #tpu.memory_space<vmem>>, %arg9: memref<1x64xf32, #tpu.memory_space<vmem>>, %arg10: memref<64x32xf32, #tpu.memory_space<vmem>>, %arg11: memref<8x32xf32, #tpu.memory_space<vmem>>, %arg12: memref<8x64xf32, #tpu.memory_space<vmem>>, %arg13: memref<8x64xf32, #tpu.memory_space<vmem>>, %arg14: memref<8x64xf32, #tpu.memory_space<vmem>>, %arg15: memref<8x64xf32, #tpu.memory_space<vmem>>, %arg16: memref<8x64xf32, #tpu.memory_space<vmem>>) attributes {dimension_semantics = [#tpu.dimension_semantics<parallel>], iteration_bounds = array<i64: 2>, scalar_prefetch = 0 : i64, scratch_operands = 5 : i64, tpu.core_type = #tpu.core_type<tc>, window_params = [{transform_indices = @transform_0, window_bounds = array<i64: 8, 32>}, {transform_indices = @transform_1, window_bounds = array<i64: 8, 32>}, {transform_indices = @transform_2, window_bounds = array<i64: 8, 32>}, {transform_indices = @transform_3, window_bounds = array<i64: 1, 1, 8>}, {transform_indices = @transform_4, window_bounds = array<i64: 1, 4, 8, 8>}, {pipeline_mode = #tpu.pipeline_mode<synchronous>, transform_indices = @transform_5, window_bounds = array<i64: 32, 128>}, {pipeline_mode = #tpu.pipeline_mode<synchronous>, transform_indices = @transform_6, window_bounds = array<i64: 32, 64>}, {pipeline_mode = #tpu.pipeline_mode<synchronous>, transform_indices = @transform_7, window_bounds = array<i64: 32, 64>}, {pipeline_mode = #tpu.pipeline_mode<synchronous>, transform_indices = @transform_8, window_bounds = array<i64: 1, 64>}, {pipeline_mode = #tpu.pipeline_mode<synchronous>, transform_indices = @transform_9, window_bounds = array<i64: 64, 32>}, {transform_indices = @transform_10, window_bounds = array<i64: 8, 32>}]} {
    %c0 = arith.constant 0 : index
    %c0_0 = arith.constant 0 : index
    %0 = vector.load %arg1[%c0, %c0_0] : memref<8x32xf32, #tpu.memory_space<vmem>>, vector<8x32xf32>
    %c0_1 = arith.constant 0 : index
    %c0_2 = arith.constant 0 : index
    %1 = vector.load %arg6[%c0_1, %c0_2] : memref<32x128xf32, #tpu.memory_space<vmem>>, vector<32x128xf32>
    %cst = arith.constant dense<0.000000e+00> : vector<8x128xf32>
    %2 = tpu.matmul %0, %1, %cst {dimension_numbers = #tpu.dot_dimension_numbers<[1], [0], [0], [1], [0, 0, 1, 1], [], []>} : vector<8x32xf32>, vector<32x128xf32>, vector<8x128xf32> -> vector<8x128xf32>
    %3 = vector.extract_strided_slice %2 {offsets = [0, 0], sizes = [8, 64], strides = [1, 1]} : vector<8x128xf32> to vector<8x64xf32>
    %c0_3 = arith.constant 0 : index
    %c0_4 = arith.constant 0 : index
    %4 = vector.load %arg12[%c0_3, %c0_4] : memref<8x64xf32, #tpu.memory_space<vmem>>, vector<8x64xf32>
    tpu.vector_store %arg12[%c0_3, %c0_4], %3 {strides = array<i32>} : memref<8x64xf32, #tpu.memory_space<vmem>>, vector<8x64xf32>,
    %5 = vector.extract_strided_slice %2 {offsets = [0, 64], sizes = [8, 64], strides = [1, 1]} : vector<8x128xf32> to vector<8x64xf32>
    %c0_5 = arith.constant 0 : index
    %c0_6 = arith.constant 0 : index
    %6 = vector.load %arg9[%c0_5, %c0_6] : memref<1x64xf32, #tpu.memory_space<vmem>>, vector<1x64xf32>
    %7 = vector.broadcast %6 : vector<1x64xf32> to vector<8x64xf32>
    %8 = arith.addf %5, %7 : vector<8x64xf32>
    %9 = arith.negf %8 : vector<8x64xf32>
    %10 = math.exp %9 : vector<8x64xf32>
    %cst_7 = arith.constant 1.000000e+00 : f32
    %11 = vector.broadcast %cst_7 : f32 to vector<8x64xf32>
    %12 = arith.addf %11, %10 : vector<8x64xf32>
    %13 = arith.divf %11, %12 : vector<8x64xf32>
    %c0_8 = arith.constant 0 : index
    %c0_9 = arith.constant 0 : index
    %14 = vector.load %arg15[%c0_8, %c0_9] : memref<8x64xf32, #tpu.memory_space<vmem>>, vector<8x64xf32>
    tpu.vector_store %arg15[%c0_8, %c0_9], %13 {strides = array<i32>} : memref<8x64xf32, #tpu.memory_space<vmem>>, vector<8x64xf32>,
    %c0_10 = arith.constant 0 : index
    %c0_11 = arith.constant 0 : index
    %15 = vector.load %arg2[%c0_10, %c0_11] : memref<8x32xf32, #tpu.memory_space<vmem>>, vector<8x32xf32>
    %c0_12 = arith.constant 0 : index
    %c0_13 = arith.constant 0 : index
    %16 = vector.load %arg7[%c0_12, %c0_13] : memref<32x64xf32, #tpu.memory_space<vmem>>, vector<32x64xf32>
    %cst_14 = arith.constant dense<0.000000e+00> : vector<8x64xf32>
    %17 = tpu.matmul %15, %16, %cst_14 {dimension_numbers = #tpu.dot_dimension_numbers<[1], [0], [0], [1], [0, 0, 1, 1], [], []>} : vector<8x32xf32>, vector<32x64xf32>, vector<8x64xf32> -> vector<8x64xf32>
    %c0_15 = arith.constant 0 : index
    %c0_16 = arith.constant 0 : index
    %18 = vector.load %arg13[%c0_15, %c0_16] : memref<8x64xf32, #tpu.memory_space<vmem>>, vector<8x64xf32>
    tpu.vector_store %arg13[%c0_15, %c0_16], %17 {strides = array<i32>} : memref<8x64xf32, #tpu.memory_space<vmem>>, vector<8x64xf32>,
    %c0_17 = arith.constant 0 : index
    %c0_18 = arith.constant 0 : index
    %19 = vector.load %arg3[%c0_17, %c0_18] : memref<8x32xf32, #tpu.memory_space<vmem>>, vector<8x32xf32>
    %c0_19 = arith.constant 0 : index
    %c0_20 = arith.constant 0 : index
    %20 = vector.load %arg8[%c0_19, %c0_20] : memref<32x64xf32, #tpu.memory_space<vmem>>, vector<32x64xf32>
    %cst_21 = arith.constant dense<0.000000e+00> : vector<8x64xf32>
    %21 = tpu.matmul %19, %20, %cst_21 {dimension_numbers = #tpu.dot_dimension_numbers<[1], [0], [0], [1], [0, 0, 1, 1], [], []>} : vector<8x32xf32>, vector<32x64xf32>, vector<8x64xf32> -> vector<8x64xf32>
    %c0_22 = arith.constant 0 : index
    %c0_23 = arith.constant 0 : index
    %22 = vector.load %arg14[%c0_22, %c0_23] : memref<8x64xf32, #tpu.memory_space<vmem>>, vector<8x64xf32>
    tpu.vector_store %arg14[%c0_22, %c0_23], %21 {strides = array<i32>} : memref<8x64xf32, #tpu.memory_space<vmem>>, vector<8x64xf32>,
    %c0_i32 = arith.constant 0 : i32
    %c8_i32 = arith.constant 8 : i32
    %23 = arith.muli %c0_i32, %c8_i32 : i32
    %c8_i32_24 = arith.constant 8 : i32
    %24 = arith.muli %c0_i32, %c8_i32_24 : i32
    %25 = tpu.assume_multiple %23, 8 : i32
    %26 = tpu.assume_multiple %24, 8 : i32
    %27 = arith.index_cast %25 : i32 to index
    %c0_25 = arith.constant 0 : index
    %28 = vector.load %arg12[%27, %c0_25] : memref<8x64xf32, #tpu.memory_space<vmem>>, vector<8x64xf32>
    %29 = arith.index_cast %26 : i32 to index
    %c0_26 = arith.constant 0 : index
    %30 = vector.load %arg13[%29, %c0_26] : memref<8x64xf32, #tpu.memory_space<vmem>>, vector<8x64xf32>
    %31 = arith.index_cast %26 : i32 to index
    %c0_27 = arith.constant 0 : index
    %32 = vector.load %arg14[%31, %c0_27] : memref<8x64xf32, #tpu.memory_space<vmem>>, vector<8x64xf32>
    %33 = arith.index_cast %25 : i32 to index
    %c0_28 = arith.constant 0 : index
    %34 = vector.load %arg15[%33, %c0_28] : memref<8x64xf32, #tpu.memory_space<vmem>>, vector<8x64xf32>
    %35 = arith.index_cast %c0_i32 : i32 to index
    %c0_29 = arith.constant 0 : index
    %c0_30 = arith.constant 0 : index
    %36 = vector.load %arg4[%35, %c0_29, %c0_30] : memref<1x1x8xf32, #tpu.memory_space<vmem>>, vector<1x1x8xf32>
    %37 = vector.shape_cast %36 : vector<1x1x8xf32> to vector<1x8xf32>
    %38 = vector.extract_strided_slice %28 {offsets = [0, 0], sizes = [8, 16], strides = [1, 1]} : vector<8x64xf32> to vector<8x16xf32>
    %39 = vector.extract_strided_slice %30 {offsets = [0, 0], sizes = [8, 16], strides = [1, 1]} : vector<8x64xf32> to vector<8x16xf32>
    "tpu.trace_start"() <{level = 10 : i32, message = "qd,kd->qk"}> : () -> ()
    %cst_31 = arith.constant dense<0.000000e+00> : vector<8x8xf32>
    %40 = tpu.matmul %38, %39, %cst_31 {dimension_numbers = #tpu.dot_dimension_numbers<[1], [1], [0], [0], [0, 0, 1, 0], [], []>} : vector<8x16xf32>, vector<8x16xf32>, vector<8x8xf32> -> vector<8x8xf32>
    "tpu.trace_stop"() : () -> ()
    %41 = vector.broadcast %37 : vector<1x8xf32> to vector<8x8xf32>
    %42 = arith.addf %40, %41 : vector<8x8xf32>
    %43 = arith.index_cast %c0_i32 : i32 to index
    %c0_32 = arith.constant 0 : index
    %c0_33 = arith.constant 0 : index
    %c0_34 = arith.constant 0 : index
    %44 = vector.load %arg5[%43, %c0_32, %c0_33, %c0_34] : memref<1x4x8x8xf32, #tpu.memory_space<vmem>>, vector<1x1x8x8xf32>
    %45 = vector.shape_cast %44 : vector<1x1x8x8xf32> to vector<8x8xf32>
    %46 = arith.addf %42, %45 : vector<8x8xf32>
    %cst_35 = arith.constant dense<0xFF800000> : vector<8xf32>
    %47 = vector.multi_reduction <maximumf>, %46, %cst_35 [1] : vector<8x8xf32> to vector<8xf32>
    %48 = vector.shape_cast %47 : vector<8xf32> to vector<8x1xf32>
    %49 = vector.broadcast %48 : vector<8x1xf32> to vector<8x8xf32>
    %50 = arith.subf %46, %49 : vector<8x8xf32>
    %51 = math.exp %50 : vector<8x8xf32>
    %cst_36 = arith.constant dense<0.000000e+00> : vector<8xf32>
    %52 = vector.multi_reduction <add>, %51, %cst_36 [1] : vector<8x8xf32> to vector<8xf32>
    %53 = vector.shape_cast %52 : vector<8xf32> to vector<8x1xf32>
    %54 = vector.broadcast %53 : vector<8x1xf32> to vector<8x8xf32>
    %55 = arith.divf %51, %54 : vector<8x8xf32>
    %56 = vector.extract_strided_slice %32 {offsets = [0, 0], sizes = [8, 16], strides = [1, 1]} : vector<8x64xf32> to vector<8x16xf32>
    %cst_37 = arith.constant dense<0.000000e+00> : vector<8x16xf32>
    %57 = tpu.matmul %55, %56, %cst_37 {dimension_numbers = #tpu.dot_dimension_numbers<[1], [0], [0], [1], [0, 0, 1, 1], [], []>} : vector<8x8xf32>, vector<8x16xf32>, vector<8x16xf32> -> vector<8x16xf32>
    %58 = vector.extract_strided_slice %28 {offsets = [0, 16], sizes = [8, 16], strides = [1, 1]} : vector<8x64xf32> to vector<8x16xf32>
    %59 = vector.extract_strided_slice %30 {offsets = [0, 16], sizes = [8, 16], strides = [1, 1]} : vector<8x64xf32> to vector<8x16xf32>
    "tpu.trace_start"() <{level = 10 : i32, message = "qd,kd->qk"}> : () -> ()
    %cst_38 = arith.constant dense<0.000000e+00> : vector<8x8xf32>
    %60 = tpu.matmul %58, %59, %cst_38 {dimension_numbers = #tpu.dot_dimension_numbers<[1], [1], [0], [0], [0, 0, 1, 0], [], []>} : vector<8x16xf32>, vector<8x16xf32>, vector<8x8xf32> -> vector<8x8xf32>
    "tpu.trace_stop"() : () -> ()
    %61 = vector.broadcast %37 : vector<1x8xf32> to vector<8x8xf32>
    %62 = arith.addf %60, %61 : vector<8x8xf32>
    %63 = arith.index_cast %c0_i32 : i32 to index
    %c1 = arith.constant 1 : index
    %c0_39 = arith.constant 0 : index
    %c0_40 = arith.constant 0 : index
    %64 = vector.load %arg5[%63, %c1, %c0_39, %c0_40] : memref<1x4x8x8xf32, #tpu.memory_space<vmem>>, vector<1x1x8x8xf32>
    %65 = vector.shape_cast %64 : vector<1x1x8x8xf32> to vector<8x8xf32>
    %66 = arith.addf %62, %65 : vector<8x8xf32>
    %cst_41 = arith.constant dense<0xFF800000> : vector<8xf32>
    %67 = vector.multi_reduction <maximumf>, %66, %cst_41 [1] : vector<8x8xf32> to vector<8xf32>
    %68 = vector.shape_cast %67 : vector<8xf32> to vector<8x1xf32>
    %69 = vector.broadcast %68 : vector<8x1xf32> to vector<8x8xf32>
    %70 = arith.subf %66, %69 : vector<8x8xf32>
    %71 = math.exp %70 : vector<8x8xf32>
    %cst_42 = arith.constant dense<0.000000e+00> : vector<8xf32>
    %72 = vector.multi_reduction <add>, %71, %cst_42 [1] : vector<8x8xf32> to vector<8xf32>
    %73 = vector.shape_cast %72 : vector<8xf32> to vector<8x1xf32>
    %74 = vector.broadcast %73 : vector<8x1xf32> to vector<8x8xf32>
    %75 = arith.divf %71, %74 : vector<8x8xf32>
    %76 = vector.extract_strided_slice %32 {offsets = [0, 16], sizes = [8, 16], strides = [1, 1]} : vector<8x64xf32> to vector<8x16xf32>
    %cst_43 = arith.constant dense<0.000000e+00> : vector<8x16xf32>
    %77 = tpu.matmul %75, %76, %cst_43 {dimension_numbers = #tpu.dot_dimension_numbers<[1], [0], [0], [1], [0, 0, 1, 1], [], []>} : vector<8x8xf32>, vector<8x16xf32>, vector<8x16xf32> -> vector<8x16xf32>
    %78 = vector.extract_strided_slice %28 {offsets = [0, 32], sizes = [8, 16], strides = [1, 1]} : vector<8x64xf32> to vector<8x16xf32>
    %79 = vector.extract_strided_slice %30 {offsets = [0, 32], sizes = [8, 16], strides = [1, 1]} : vector<8x64xf32> to vector<8x16xf32>
    "tpu.trace_start"() <{level = 10 : i32, message = "qd,kd->qk"}> : () -> ()
    %cst_44 = arith.constant dense<0.000000e+00> : vector<8x8xf32>
    %80 = tpu.matmul %78, %79, %cst_44 {dimension_numbers = #tpu.dot_dimension_numbers<[1], [1], [0], [0], [0, 0, 1, 0], [], []>} : vector<8x16xf32>, vector<8x16xf32>, vector<8x8xf32> -> vector<8x8xf32>
    "tpu.trace_stop"() : () -> ()
    %81 = vector.broadcast %37 : vector<1x8xf32> to vector<8x8xf32>
    %82 = arith.addf %80, %81 : vector<8x8xf32>
    %83 = arith.index_cast %c0_i32 : i32 to index
    %c2 = arith.constant 2 : index
    %c0_45 = arith.constant 0 : index
    %c0_46 = arith.constant 0 : index
    %84 = vector.load %arg5[%83, %c2, %c0_45, %c0_46] : memref<1x4x8x8xf32, #tpu.memory_space<vmem>>, vector<1x1x8x8xf32>
    %85 = vector.shape_cast %84 : vector<1x1x8x8xf32> to vector<8x8xf32>
    %86 = arith.addf %82, %85 : vector<8x8xf32>
    %cst_47 = arith.constant dense<0xFF800000> : vector<8xf32>
    %87 = vector.multi_reduction <maximumf>, %86, %cst_47 [1] : vector<8x8xf32> to vector<8xf32>
    %88 = vector.shape_cast %87 : vector<8xf32> to vector<8x1xf32>
    %89 = vector.broadcast %88 : vector<8x1xf32> to vector<8x8xf32>
    %90 = arith.subf %86, %89 : vector<8x8xf32>
    %91 = math.exp %90 : vector<8x8xf32>
    %cst_48 = arith.constant dense<0.000000e+00> : vector<8xf32>
    %92 = vector.multi_reduction <add>, %91, %cst_48 [1] : vector<8x8xf32> to vector<8xf32>
    %93 = vector.shape_cast %92 : vector<8xf32> to vector<8x1xf32>
    %94 = vector.broadcast %93 : vector<8x1xf32> to vector<8x8xf32>
    %95 = arith.divf %91, %94 : vector<8x8xf32>
    %96 = vector.extract_strided_slice %32 {offsets = [0, 32], sizes = [8, 16], strides = [1, 1]} : vector<8x64xf32> to vector<8x16xf32>
    %cst_49 = arith.constant dense<0.000000e+00> : vector<8x16xf32>
    %97 = tpu.matmul %95, %96, %cst_49 {dimension_numbers = #tpu.dot_dimension_numbers<[1], [0], [0], [1], [0, 0, 1, 1], [], []>} : vector<8x8xf32>, vector<8x16xf32>, vector<8x16xf32> -> vector<8x16xf32>
    %98 = vector.extract_strided_slice %28 {offsets = [0, 48], sizes = [8, 16], strides = [1, 1]} : vector<8x64xf32> to vector<8x16xf32>
    %99 = vector.extract_strided_slice %30 {offsets = [0, 48], sizes = [8, 16], strides = [1, 1]} : vector<8x64xf32> to vector<8x16xf32>
    "tpu.trace_start"() <{level = 10 : i32, message = "qd,kd->qk"}> : () -> ()
    %cst_50 = arith.constant dense<0.000000e+00> : vector<8x8xf32>
    %100 = tpu.matmul %98, %99, %cst_50 {dimension_numbers = #tpu.dot_dimension_numbers<[1], [1], [0], [0], [0, 0, 1, 0], [], []>} : vector<8x16xf32>, vector<8x16xf32>, vector<8x8xf32> -> vector<8x8xf32>
    "tpu.trace_stop"() : () -> ()
    %101 = vector.broadcast %37 : vector<1x8xf32> to vector<8x8xf32>
    %102 = arith.addf %100, %101 : vector<8x8xf32>
    %103 = arith.index_cast %c0_i32 : i32 to index
    %c3 = arith.constant 3 : index
    %c0_51 = arith.constant 0 : index
    %c0_52 = arith.constant 0 : index
    %104 = vector.load %arg5[%103, %c3, %c0_51, %c0_52] : memref<1x4x8x8xf32, #tpu.memory_space<vmem>>, vector<1x1x8x8xf32>
    %105 = vector.shape_cast %104 : vector<1x1x8x8xf32> to vector<8x8xf32>
    %106 = arith.addf %102, %105 : vector<8x8xf32>
    %cst_53 = arith.constant dense<0xFF800000> : vector<8xf32>
    %107 = vector.multi_reduction <maximumf>, %106, %cst_53 [1] : vector<8x8xf32> to vector<8xf32>
    %108 = vector.shape_cast %107 : vector<8xf32> to vector<8x1xf32>
    %109 = vector.broadcast %108 : vector<8x1xf32> to vector<8x8xf32>
    %110 = arith.subf %106, %109 : vector<8x8xf32>
    %111 = math.exp %110 : vector<8x8xf32>
    %cst_54 = arith.constant dense<0.000000e+00> : vector<8xf32>
    %112 = vector.multi_reduction <add>, %111, %cst_54 [1] : vector<8x8xf32> to vector<8xf32>
    %113 = vector.shape_cast %112 : vector<8xf32> to vector<8x1xf32>
    %114 = vector.broadcast %113 : vector<8x1xf32> to vector<8x8xf32>
    %115 = arith.divf %111, %114 : vector<8x8xf32>
    %116 = vector.extract_strided_slice %32 {offsets = [0, 48], sizes = [8, 16], strides = [1, 1]} : vector<8x64xf32> to vector<8x16xf32>
    %cst_55 = arith.constant dense<0.000000e+00> : vector<8x16xf32>
    %117 = tpu.matmul %115, %116, %cst_55 {dimension_numbers = #tpu.dot_dimension_numbers<[1], [0], [0], [1], [0, 0, 1, 1], [], []>} : vector<8x8xf32>, vector<8x16xf32>, vector<8x16xf32> -> vector<8x16xf32>
    %118 = tpu.concatenate %57, %77, %97, %117 in 1 : vector<8x16xf32>, vector<8x16xf32>, vector<8x16xf32>, vector<8x16xf32> -> vector<8x64xf32>
    %119 = arith.mulf %34, %118 : vector<8x64xf32>
    %120 = arith.index_cast %25 : i32 to index
    %c0_56 = arith.constant 0 : index
    %121 = vector.load %arg16[%120, %c0_56] : memref<8x64xf32, #tpu.memory_space<vmem>>, vector<8x64xf32>
    tpu.vector_store %arg16[%120, %c0_56], %119 {strides = array<i32>} : memref<8x64xf32, #tpu.memory_space<vmem>>, vector<8x64xf32>,
    %c1_i32 = arith.constant 1 : i32
    %c0_57 = arith.constant 0 : index
    %c0_58 = arith.constant 0 : index
    %122 = vector.load %arg16[%c0_57, %c0_58] : memref<8x64xf32, #tpu.memory_space<vmem>>, vector<8x64xf32>
    %c0_59 = arith.constant 0 : index
    %c0_60 = arith.constant 0 : index
    %123 = vector.load %arg10[%c0_59, %c0_60] : memref<64x32xf32, #tpu.memory_space<vmem>>, vector<64x32xf32>
    %cst_61 = arith.constant dense<0.000000e+00> : vector<8x32xf32>
    %124 = tpu.matmul %122, %123, %cst_61 {dimension_numbers = #tpu.dot_dimension_numbers<[1], [0], [0], [1], [0, 0, 1, 1], [], []>} : vector<8x64xf32>, vector<64x32xf32>, vector<8x32xf32> -> vector<8x32xf32>
    %c0_62 = arith.constant 0 : index
    %c0_63 = arith.constant 0 : index
    %125 = vector.load %arg11[%c0_62, %c0_63] : memref<8x32xf32, #tpu.memory_space<vmem>>, vector<8x32xf32>
    tpu.vector_store %arg11[%c0_62, %c0_63], %124 {strides = array<i32>} : memref<8x32xf32, #tpu.memory_space<vmem>>, vector<8x32xf32>,
    return
  }
  func.func @transform_0(%arg0: i32) -> (i32, i32) {
    %c0_i32 = arith.constant 0 : i32
    %c0_i32_0 = arith.constant 0 : i32
    return %arg0, %c0_i32 : i32, i32
  }
  func.func @transform_1(%arg0: i32) -> (i32, i32) {
    %c0_i32 = arith.constant 0 : i32
    %c0_i32_0 = arith.constant 0 : i32
    return %arg0, %c0_i32 : i32, i32
  }
  func.func @transform_2(%arg0: i32) -> (i32, i32) {
    %c0_i32 = arith.constant 0 : i32
    %c0_i32_0 = arith.constant 0 : i32
    return %arg0, %c0_i32 : i32, i32
  }
  func.func @transform_3(%arg0: i32) -> (i32, i32, i32) {
    %c0_i32 = arith.constant 0 : i32
    %c0_i32_0 = arith.constant 0 : i32
    %c0_i32_1 = arith.constant 0 : i32
    return %arg0, %c0_i32, %c0_i32_0 : i32, i32, i32
  }
  func.func @transform_4(%arg0: i32) -> (i32, i32, i32, i32) {
    %c0_i32 = arith.constant 0 : i32
    %c0_i32_0 = arith.constant 0 : i32
    %c0_i32_1 = arith.constant 0 : i32
    %c0_i32_2 = arith.constant 0 : i32
    return %arg0, %c0_i32, %c0_i32_0, %c0_i32_1 : i32, i32, i32, i32
  }
  func.func @transform_5(%arg0: i32) -> (i32, i32) {
    %c0_i32 = arith.constant 0 : i32
    %c0_i32_0 = arith.constant 0 : i32
    %c0_i32_1 = arith.constant 0 : i32
    return %c0_i32, %c0_i32_0 : i32, i32
  }
  func.func @transform_6(%arg0: i32) -> (i32, i32) {
    %c0_i32 = arith.constant 0 : i32
    %c0_i32_0 = arith.constant 0 : i32
    %c0_i32_1 = arith.constant 0 : i32
    return %c0_i32, %c0_i32_0 : i32, i32
  }
  func.func @transform_7(%arg0: i32) -> (i32, i32) {
    %c0_i32 = arith.constant 0 : i32
    %c0_i32_0 = arith.constant 0 : i32
    %c0_i32_1 = arith.constant 0 : i32
    return %c0_i32, %c0_i32_0 : i32, i32
  }
  func.func @transform_8(%arg0: i32) -> (i32, i32) {
    %c0_i32 = arith.constant 0 : i32
    %c0_i32_0 = arith.constant 0 : i32
    %c0_i32_1 = arith.constant 0 : i32
    return %c0_i32, %c0_i32_0 : i32, i32
  }
  func.func @transform_9(%arg0: i32) -> (i32, i32) {
    %c0_i32 = arith.constant 0 : i32
    %c0_i32_0 = arith.constant 0 : i32
    %c0_i32_1 = arith.constant 0 : i32
    return %c0_i32, %c0_i32_0 : i32, i32
  }
  func.func @transform_10(%arg0: i32) -> (i32, i32) {
    %c0_i32 = arith.constant 0 : i32
    %c0_i32_0 = arith.constant 0 : i32
    return %arg0, %c0_i32 : i32, i32
  }
}

</mosaic_0001>

<bundles_post_ra>
// kernel: tpu_custom_call.1
= control target key start
LH: loop header
LB: loop body
LE: loop exit
PB: predicated region body
PF: predicated region fallthrough
CT: control target
= control target key end

     0   :  { %s2875_s0 = inlined_call_operand.hbm [shape: f32[16,32], index: 0, kind: input, shape index: {}]   ;;  %s2876_s1 = inlined_call_operand.hbm [shape: f32[16,32], index: 1, kind: input, shape index: {}]   ;;  %s2877_s2 = inlined_call_operand.hbm [shape: f32[16,32], index: 2, kind: input, shape index: {}]   ;;  %s2878_s3 = inlined_call_operand.vmem [shape: f32[2,1,8], index: 3, kind: input, shape index: {}]   ;;  %s2879_s4 = inlined_call_operand.vmem [shape: f32[2,4,8,8], index: 4, kind: input, shape index: {}]   ;;  %s2880_s5 = inlined_call_operand.vmem [shape: f32[32,128], index: 5, kind: input, shape index: {}]   ;;  %s2881_s6 = inlined_call_operand.hbm [shape: f32[32,64], index: 6, kind: input, shape index: {}]   ;;  %s2882_s7 = inlined_call_operand.hbm [shape: f32[32,64], index: 7, kind: input, shape index: {}]   ;;  %s2883_s8 = inlined_call_operand.hbm [shape: f32[1,64], index: 8, kind: input, shape index: {}]   ;;  %s2884_s9 = inlined_call_operand.vmem [shape: f32[64,32], index: 9, kind: input, shape index: {}]   ;;  %s2885_s10 = inlined_call_operand.hbm [shape: f32[16,32], index: 10, kind: output, shape index: {}]  }
   0x1   :  { %2910 = sst [smem:[#allocation30_spill]] %s2876_s1 }
   0x2   :  { %2911 = sst [smem:[#allocation31_spill]] %s2879_s4 }
   0x3   :  { %2912 = sst [smem:[#allocation32_spill]] %s2881_s6 }
   0x4   :  { %2913 = sst [smem:[#allocation33_spill]] %s2884_s9 }
   0x5   :  { %2914 = sst [smem:[#allocation34_spill]] %s2885_s10 }
   0x6   :  { %15 = vsyncpa [#allocation8], 0 }
   0x7   :  { %17 = vsyncpa [#allocation8 + $0x1], 0 }
   0x8   :  { %18 = vsyncpa [#allocation11], 0 }
   0x9   :  { %20 = vsyncpa [#allocation11 + $0x1], 0 }
   0xa   :  { %21 = vsyncpa [#allocation14], 0 }
   0xb   :  { %22 = vsyncpa [#allocation17], 0 }
   0xc   :  { %23 = vsyncpa [#allocation9], 0 }
   0xd   :  { %25 = vsyncpa [#allocation9 + $0x1], 0  ;;  %s2398_s13 = smov 0   ;;  %s2400_s14 = smov 0  }
   0xe   :  { %s2402_s15 = smov 0   ;;  %s2404_s16 = smov 0  }
   0xf LB: > { %2915 = sst [smem:[#allocation24_spill]] %s2310_s13  ;;  %s2419_s17 = sadd.s32 4294967295, %s2322_s16   ;;  %s2322_s16 = sphi %s2404_s16, %s2956_s16   ;;  %s2318_s15 = sphi %s2402_s15, %s2960_s15   ;;  %s2314_s14 = sphi %s2400_s14, %s2959_s14   ;;  %s2310_s13 = sphi %s2398_s13, %s2958_s13  }
  0x10   : > { %2916 = sst [smem:[#allocation25_spill]] %s2322_s16  ;;  %s1740_s18 = sadd.s32 4294967294, %s2322_s16  }
  0x11   : > { %p51_p0 = scmp.ne.s32.totalorder %s2314_s14, %s2310_s13  ;;  %p2887_p1 = scmp.eq.s32.totalorder %s2419_s17, 0 }
  0x12   : > { %p290_p3 = scmp.eq.s32.totalorder %s1740_s18, 1  ;;  %p1741_p5 = scmp.ge.s32.totalorder %s2322_s16, 1 }
  0x13   : > { %p2428_p4 = por %p2887_p1, %p51_p0  ;;  %p297_p7 = scmp.lt.s32.totalorder %s2322_s16, 3 }
  0x14   : > { %p2433_p6 = por %p290_p3, %p51_p0  ;;  %s2324_s22 = smov [#allocation13]  }
  0x15   : > { %s2917_s19 = scalar_select %p2428_p4, 1, 0 }
  0x16   : > { %s2918_s20 = scalar_select %p2433_p6, 1, 0 }
  0x17   : > { %p2438_p8 = pnand %p1741_p5, %p297_p7  ;;  %s312_s23 = sshll.u32 %s2324_s22, 4  ;;  %s2442_s23 = int_to_ptr.vmem [resolvable:$true] %s312_s23 }
  0x18   : > { %2919 = sst [smem:[#allocation26_spill]] %s2918_s20  ;;  %s2454_s25 = sadd.s32 1, %s2322_s16  }
  0x19   : > { %s2920_s21 = scalar_select %p2438_p8, 1, 0 }
  0x1a   : > { %p1971_p9 = pneg %p2438_p8  ;;  %2922 = sst [smem:[#allocation27_spill]] %s2454_s25 }
  0x1b   : > { %s38_s26 = sadd.s32 1, %s2318_s15  ;;  %s35_s27 = ssub.s32 %s2322_s16, %s2454_s25 }
  0x1c   : > { %p2449_p11 = pnand %p1971_p9, %p2887_p1  ;;  %s2923_s6 = sld [smem:[#allocation32_spill]] }
  0x1e   : > { %s2921_s24 = scalar_select %p2449_p11, 1, 0 }
  0x1f   : > { %p2467_p13 = pneg %p2449_p11 }
  0x21   : > { %s2924_s18 = scalar_select %p2467_p13, 1, 0 }
  0x22   : > { %s2070_s30 = scalar_lea.hbm %s2923_s6, 512 }
  0x23   : > { %p2071_p12 = scmp.ne.s32.totalorder %s2923_s6, %s2070_s30  ;;  %p2077_p5 = scmp.lt.u32.totalorder %s2070_s30, %s2923_s6 }
  0x25   : > { %p2073_p0 = pnand %p2467_p13, %p2071_p12 }
  0x27   : > { %p2074_p3 = pneg %p2073_p0 }
  0x29   : > { %p2079_p7 = pnand %p2077_p5, %p2074_p3 }
  0x2b   : > { %2082 = shalt.err (!%p2079_p7)
}
  0x2c   : > { %s2083_s28 = scalar_lea.vmem %s2442_s23, 512  ;;  %p2091_p2 = scmp.lt.s32.totalorder %s2442_s23, %s2442_s23 }
  0x2d   : > { %p2084_p9 = scmp.ne.s32.totalorder %s2442_s23, %s2083_s28  ;;  %p2092_p6 = scmp.lt.s32.totalorder %s2083_s28, %s2083_s28 }
  0x2f   : > { %p2086_p10 = pnand %p2084_p9, %p2467_p13  ;;  %p2093_p12 = por %p2092_p6, %p2091_p2 }
  0x31   : > { %p2087_p1 = pneg %p2086_p10 }
  0x33   : > { %p2094_p0 = pnand %p2093_p12, %p2087_p1 }
  0x35   : > { %2097 = shalt.err (!%p2094_p0)
}
  0x36   : > { %s2891_s29 = smov 128   ;;  %s2892_s20 = smov 8  }
  0x37   : > { %1974 = dma.hbm_to_vmem [thread:$0]  (!%p2449_p11), %s2923_s6, 512, %s2442_s23, [#allocation14], %s2891_s29, %s2891_s29, %s2892_s20  }
  0x38   : > { %p36_p1 = scmp.eq.s32.totalorder %s35_s27, 0  ;;  %p45_p2 = scmp.ne.s32.totalorder %s2318_s15, %s2314_s14 }
  0x39   : > { %p46_p6 = scmp.eq.s32.totalorder %s2322_s16, 0  ;;  %p1998_p10 = scmp.lt.s32.totalorder %s2322_s16, 2 }
  0x3a   : > { %s2496_s12 = scalar_select %p36_p1, %s2318_s15, %s38_s26  }
  0x3b   : > { %p47_p3 = por %p46_p6, %p45_p2  ;;  %p2926_p5 = scmp.eq.s32.totalorder %s2419_s17, 1 }
  0x3c   : > { %2925 = sst [smem:[#allocation28_spill]] %s2496_s12  ;;  %s2893_s28 = sand.u32 1, %s2318_s15  }
  0x3d   : > { %p2500_p7 = por %p2926_p5, %p45_p2  ;;  %s2506_s25 = sshll.u32 %s2322_s16, 7 }
  0x3e   : > { %s2510_s13 = sshll.u32 %s2893_s28, 3  ;;  %p2512_p9 = pnand %p1998_p10, %p47_p3 }
  0x3f   : > { %s2927_s22 = scalar_select %p2500_p7, 1, 0 }
  0x40   : > { %s2929_s23 = scalar_select %p2512_p9, 1, 0 }
  0x41   : > { %2928 = sst [smem:[#allocation29_spill]] %s2927_s22  ;;  %s371_s26 = sand.u32 1, %s2322_s16  }
  0x42   : > { %s2930_s1 = sld [smem:[#allocation30_spill]]  ;;  %s375_s29 = scalar_lea.vmem [#allocation10], %s2510_s13 }
  0x43   : > { %s382_s20 = sshll.u32 %s375_s29, 4  ;;  %s2526_s28 = scalar_lea.sflag [#allocation11], %s371_s26  ;;  %s2524_s20 = int_to_ptr.vmem [resolvable:$true] %s382_s20 }
  0x44   : > { %p2532_p0 = pneg %p2512_p9 }
  0x46   : > { %s2931_s12 = scalar_select %p2532_p0, 1, 0 }
  0x48   : > { %s2521_s11 = scalar_lea.hbm %s2930_s1, %s2506_s25  ;;  %s2103_s16 = scalar_lea.hbm %s2930_s1, 256 }
  0x49   : > { %s2098_s6 = scalar_lea.hbm %s2521_s11, 128  ;;  %p2104_p6 = scmp.lt.u32.totalorder %s2521_s11, %s2930_s1 }
  0x4a   : > { %p2099_p12 = scmp.ne.s32.totalorder %s2521_s11, %s2098_s6  ;;  %p2105_p10 = scmp.lt.u32.totalorder %s2103_s16, %s2098_s6 }
  0x4b   : > { %p2107_p5 = scmp.lt.u32.totalorder %s2098_s6, %s2521_s11 }
  0x4c   : > { %p2101_p1 = pnand %p2532_p0, %p2099_p12  ;;  %p2106_p3 = por %p2105_p10, %p2104_p6 }
  0x4e   : > { %p2102_p2 = pneg %p2101_p1  ;;  %p2108_p7 = por %p2107_p5, %p2106_p3 }
  0x50   : > { %p2109_p4 = pnand %p2108_p7, %p2102_p2 }
  0x52   : > { %2112 = shalt.err (!%p2109_p4)
}
  0x53   : > { %s2113_s26 = scalar_lea.vmem %s2524_s20, 128  ;;  %s2327_s27 = smov [#allocation10]  }
  0x54   : > { %p2114_p12 = scmp.ne.s32.totalorder %s2524_s20, %s2113_s26  ;;  %s2118_s30 = sshll.u32 %s2327_s27, 4  ;;  %s2119_s30 = int_to_ptr.vmem [resolvable:$false] %s2118_s30 }
  0x55   : > { %s2120_s10 = scalar_lea.vmem %s2119_s30, 256  ;;  %p2121_p11 = scmp.lt.s32.totalorder %s2524_s20, %s2119_s30 }
  0x56   : > { %p2116_p1 = pnand %p2114_p12, %p2532_p0  ;;  %p2122_p13 = scmp.lt.s32.totalorder %s2120_s10, %s2113_s26 }
  0x58   : > { %p2117_p8 = pneg %p2116_p1  ;;  %p2123_p6 = por %p2122_p13, %p2121_p11 }
  0x5a   : > { %p2124_p10 = pnand %p2123_p6, %p2117_p8 }
  0x5c   : > { %2127 = shalt.err (!%p2124_p10)
}
  0x5d   : > { %1987 = dma.hbm_to_vmem [thread:$0]  (!%p2512_p9), %s2521_s11, 128, %s2524_s20, %s2526_s28  }
  0x5e   : > { %s2328_s6 = smov [#allocation15]   ;;  %s2329_s29 = smov [#allocation16]  }
  0x5f   : > { %s325_s16 = sshll.u32 %s2328_s6, 4  ;;  %s339_s1 = sshll.u32 %s2329_s29, 4  ;;  %s326_s16 = int_to_ptr.vmem [resolvable:$true] %s325_s16  ;;  %s340_s1 = int_to_ptr.vmem [resolvable:$true] %s339_s1 }
  0x60   : > { %s2128_s30 = scalar_lea.hbm %s2882_s7, 512  ;;  %p2932_p8 = scmp.ne.s32.totalorder %s2924_s18, 0 }
  0x61   : > { %p2129_p4 = scmp.ne.s32.totalorder %s2882_s7, %s2128_s30  ;;  %p2135_p7 = scmp.lt.u32.totalorder %s2128_s30, %s2882_s7 }
  0x63   : > { %p2131_p11 = pnand %p2129_p4, %p2932_p8 }
  0x65   : > { %p2132_p13 = pneg %p2131_p11 }
  0x67   : > { %p2137_p2 = pnand %p2135_p7, %p2132_p13 }
  0x69   : > { %2140 = shalt.err (!%p2137_p2)
}
  0x6a   : > { %s2141_s20 = scalar_lea.vmem %s326_s16, 512  ;;  %p2149_p1 = scmp.lt.s32.totalorder %s326_s16, %s326_s16 }
  0x6b   : > { %p2142_p3 = scmp.ne.s32.totalorder %s326_s16, %s2141_s20  ;;  %p2150_p6 = scmp.lt.s32.totalorder %s2141_s20, %s2141_s20 }
  0x6d   : > { %p2144_p5 = pnand %p2142_p3, %p2932_p8  ;;  %p2151_p10 = por %p2150_p6, %p2149_p1 }
  0x6f   : > { %p2145_p12 = pneg %p2144_p5 }
  0x71   : > { %p2152_p9 = pnand %p2151_p10, %p2145_p12 }
  0x73   : > { %2155 = shalt.err (!%p2152_p9)
}
  0x74   : > { %p2933_p4 = scmp.ne.s32.totalorder %s2921_s24, 0  ;;  %s2934_s22 = smov 8  }
  0x75   : > { %s2935_s11 = smov 128   ;;  %s2156_s27 = scalar_lea.hbm %s2883_s8, 16 }
  0x76   : > { %1977 = dma.hbm_to_vmem [thread:$0]  (!%p2933_p4), %s2882_s7, 512, %s326_s16, [#allocation14], %s2935_s11, %s2935_s11, %s2934_s22  }
  0x77   : > { %p2157_p11 = scmp.ne.s32.totalorder %s2883_s8, %s2156_s27  ;;  %p2163_p7 = scmp.lt.u32.totalorder %s2156_s27, %s2883_s8 }
  0x79   : > { %p2159_p9 = pnand %p2157_p11, %p2932_p8 }
  0x7b   : > { %p2160_p13 = pneg %p2159_p9 }
  0x7d   : > { %p2165_p2 = pnand %p2163_p7, %p2160_p13 }
  0x7f   : > { %2168 = shalt.err (!%p2165_p2)
}
  0x80   : > { %s2169_s4 = scalar_lea.vmem %s340_s1, 16  ;;  %s2176_s16 = scalar_lea.vmem %s340_s1, 32 }
  0x81   : > { %p2170_p3 = scmp.ne.s32.totalorder %s340_s1, %s2169_s4  ;;  %p2177_p1 = scmp.lt.s32.totalorder %s340_s1, %s340_s1 }
  0x82   : > { %p2178_p6 = scmp.lt.s32.totalorder %s2176_s16, %s2169_s4 }
  0x83   : > { %p2172_p5 = pnand %p2170_p3, %p2932_p8 }
  0x84   : > { %p2179_p10 = por %p2178_p6, %p2177_p1 }
  0x85   : > { %p2173_p12 = pneg %p2172_p5 }
  0x87   : > { %p2180_p0 = pnand %p2179_p10, %p2173_p12 }
  0x89   : > { %2183 = shalt.err (!%p2180_p0)
}
  0x8a   : > { %1980 = dma.hbm_to_vmem [thread:$0]  (!%p2933_p4), %s2883_s8, 16, %s340_s1, [#allocation17]  }
  0x8b   : > { %s2599_s6 = scalar_lea.hbm %s2875_s0, %s2506_s25  ;;  %s357_s29 = scalar_lea.vmem [#allocation7], %s2510_s13 }
  0x8c   : > { %s364_s24 = sshll.u32 %s357_s29, 4  ;;  %s2608_s26 = scalar_lea.hbm %s2877_s2, %s2506_s25  ;;  %s2602_s24 = int_to_ptr.vmem [resolvable:$true] %s364_s24 }
  0x8d   : > { %s2936_s10 = sand.u32 1, %s2318_s15   ;;  %s2184_s20 = scalar_lea.hbm %s2599_s6, 128 }
  0x8e   : > { %s354_s1 = scalar_lea.sflag [#allocation8], %s2936_s10  ;;  %p2185_p0 = scmp.ne.s32.totalorder %s2599_s6, %s2184_s20 }
  0x8f   : > { %p2937_p8 = scmp.ne.s32.totalorder %s2931_s12, 0  ;;  %s2189_s22 = scalar_lea.hbm %s2875_s0, 256 }
  0x90   : > { %p2190_p9 = scmp.lt.u32.totalorder %s2599_s6, %s2875_s0  ;;  %p2191_p13 = scmp.lt.u32.totalorder %s2189_s22, %s2184_s20 }
  0x91   : > { %p2187_p4 = pnand %p2185_p0, %p2937_p8  ;;  %p2193_p2 = scmp.lt.u32.totalorder %s2184_s20, %s2599_s6 }
  0x92   : > { %p2192_p7 = por %p2191_p13, %p2190_p9 }
  0x93   : > { %p2188_p11 = pneg %p2187_p4 }
  0x94   : > { %p2194_p3 = por %p2193_p2, %p2192_p7 }
  0x96   : > { %p2195_p5 = pnand %p2194_p3, %p2188_p11 }
  0x98   : > { %2198 = shalt.err (!%p2195_p5)
}
  0x99   : > { %s2199_s25 = scalar_lea.vmem %s2602_s24, 128  ;;  %s2330_s9 = smov [#allocation7]  }
  0x9a   : > { %p2200_p12 = scmp.ne.s32.totalorder %s2602_s24, %s2199_s25  ;;  %s2204_s29 = sshll.u32 %s2330_s9, 4  ;;  %s2205_s29 = int_to_ptr.vmem [resolvable:$false] %s2204_s29 }
  0x9b   : > { %s2206_s27 = scalar_lea.vmem %s2205_s29, 256  ;;  %p2207_p10 = scmp.lt.s32.totalorder %s2602_s24, %s2205_s29 }
  0x9c   : > { %p2202_p1 = pnand %p2200_p12, %p2937_p8  ;;  %p2208_p0 = scmp.lt.s32.totalorder %s2206_s27, %s2199_s25 }
  0x9e   : > { %p2203_p6 = pneg %p2202_p1  ;;  %p2209_p4 = por %p2208_p0, %p2207_p10 }
  0xa0   : > { %p2210_p9 = pnand %p2209_p4, %p2203_p6 }
  0xa2   : > { %2213 = shalt.err (!%p2210_p9)
}
  0xa3   : > { %p2938_p11 = scmp.ne.s32.totalorder %s2929_s23, 0  ;;  %s393_s30 = scalar_lea.vmem [#allocation12], %s2510_s13 }
  0xa4   : > { %s400_s10 = sshll.u32 %s393_s30, 4  ;;  %s2214_s20 = scalar_lea.hbm %s2608_s26, 128  ;;  %s401_s10 = int_to_ptr.vmem [resolvable:$true] %s400_s10 }
  0xa5   : > { %1984 = dma.hbm_to_vmem [thread:$0]  (!%p2938_p11), %s2599_s6, 128, %s2602_s24, %s354_s1  }
  0xa6   : > { %p2215_p13 = scmp.ne.s32.totalorder %s2608_s26, %s2214_s20  ;;  %s2219_s22 = scalar_lea.hbm %s2877_s2, 256 }
  0xa7   : > { %p2220_p3 = scmp.lt.u32.totalorder %s2608_s26, %s2877_s2  ;;  %p2221_p5 = scmp.lt.u32.totalorder %s2219_s22, %s2214_s20 }
  0xa8   : > { %p2217_p7 = pnand %p2215_p13, %p2937_p8  ;;  %p2223_p1 = scmp.lt.u32.totalorder %s2214_s20, %s2608_s26 }
  0xa9   : > { %p2222_p12 = por %p2221_p5, %p2220_p3 }
  0xaa   : > { %p2218_p2 = pneg %p2217_p7 }
  0xab   : > { %p2224_p6 = por %p2223_p1, %p2222_p12 }
  0xad   : > { %p2225_p10 = pnand %p2224_p6, %p2218_p2 }
  0xaf   : > { %2228 = shalt.err (!%p2225_p10)
}
  0xb0   : > { %s2229_s13 = scalar_lea.vmem %s401_s10, 128  ;;  %s2331_s6 = smov [#allocation12]  }
  0xb1   : > { %p2230_p0 = scmp.ne.s32.totalorder %s401_s10, %s2229_s13  ;;  %s2234_s24 = sshll.u32 %s2331_s6, 4  ;;  %s2235_s24 = int_to_ptr.vmem [resolvable:$false] %s2234_s24 }
  0xb2   : > { %s2236_s1 = scalar_lea.vmem %s2235_s24, 256  ;;  %p2237_p13 = scmp.lt.s32.totalorder %s401_s10, %s2235_s24 }
  0xb3   : > { %p2232_p4 = pnand %p2230_p0, %p2937_p8  ;;  %p2238_p7 = scmp.lt.s32.totalorder %s2236_s1, %s2229_s13 }
  0xb5   : > { %p2233_p9 = pneg %p2232_p4  ;;  %p2239_p11 = por %p2238_p7, %p2237_p13 }
  0xb7   : > { %p2240_p3 = pnand %p2239_p11, %p2233_p9 }
  0xb9   : > { %2243 = shalt.err (!%p2240_p3)
}
  0xba   : > { %p2939_p5 = scmp.ne.s32.totalorder %s2929_s23, 0  ;;  %p2940_p2 = scmp.ne.s32.totalorder %s2920_s21, 0 }
  0xbb   : > { %s2655_s12 = sand.u32 (!%p2940_p2), 1, %s2314_s14   ;;  %p2941_p8 = scmp.ne.s32.totalorder (!%p2940_p2), %s2917_s19, 0 }
  0xbc   : > { %1990 = dma.hbm_to_vmem [thread:$0]  (!%p2939_p5), %s2608_s26, 128, %s401_s10, %s2526_s28  }
  0xbd   : > { %423 = sbr.rel (%p2940_p2) target bundleno = 1666 (0x682), region = 60  ;;  %s2658_s25 = sshll.u32 (!%p2940_p2), %s2655_s12, 3 }
  0xbe   : > { %s426_s9 = scalar_lea.sflag (!%p2940_p2), [#allocation8], %s2655_s12  ;;  %s429_s29 = scalar_lea.vmem (!%p2940_p2), [#allocation7], %s2658_s25 }
  0xc4   : > { %2289 = dma.done.wait (%p2941_p8), %s426_s9, 128  }
  0xc5   : > { %2291 = vsyncadd (%p2941_p8), %s426_s9, 4294967168  ;;  %s434_s21 = sand.u32 1, %s2419_s17   ;;  %s438_s23 = scalar_lea.vmem [#allocation10], %s2658_s25 }
  0xc6   : > { %s435_s28 = scalar_lea.sflag [#allocation11], %s434_s21 }
  0xc7   : > { %2293 = dma.done.wait (%p2941_p8), %s435_s28, 256  }
  0xc8   : > { %2295 = vsyncadd (%p2941_p8), %s435_s28, 4294967040  ;;  %s447_s26 = scalar_lea.vmem [#allocation12], %s2658_s25  ;;  %p2942_p11 = scmp.eq.s32.totalorder %s2419_s17, 0 }
  0xca   : > { %2297 = dma.done.wait (%p2942_p11), [#allocation14], 1024   ;;  %p2943_p12 = pmov %p2942_p11 }
  0xcb   : > { %p2944_p1 = pmov %p2942_p11 }
  0xcc   : > { %2299 = vsyncadd (%p2943_p12), [#allocation14], 4294966272 }
  0xcd   : > { %2301 = dma.done.wait (%p2944_p1), [#allocation17], 16   ;;  %p2945_p6 = pmov %p2944_p1 }
  0xce   : > { %v2332_v0 = vmov 0.0|0.0   ;;  %vm2333_vm0 = vmmov 0   ;;  %v2334_v1 = vmov 0.0   ;;  %v523_v2 = vld [vmem:[%s2880_s5] sm:$0xff]  ;;  %v524_v3 = vld [vmem:[%s2880_s5 + $0x8] sm:$0xff]  ;;  %v525_v4 = vld [vmem:[%s2880_s5 + $0x10] sm:$0xff] }
  0xcf   : > { %2303 = vsyncadd (%p2945_p6), [#allocation17], 4294967280  ;;  %1921 = vmatprep.subr.bf16.mxu1 %v2332_v0  ;;  %1837 = vmatprep.mubr.msk.f32.mxu1 %vm2333_vm0, %v2334_v1  ;;  %v1922_v5 = vpack.c.bf16 %v524_v3, %v523_v2  ;;  %v526_v6 = vld [vmem:[%s2880_s5 + $0x18] sm:$0xff]  ;;  %v626_v9 = vld [vmem:[#allocation13 + $0x8] sm:$0xff]  ;;  %vm527_vm1 = vcmask 261120   ;;  %vm601_vm2 = vcmask 523264  }
  0xd0   : > { %1933 = vmatprep.subr.bf16.mxu0 %v2332_v0  ;;  %1859 = vmatprep.mubr.msk.f32.mxu0 %vm2333_vm0, %v2334_v1  ;;  %v1925_v7 = vpack.c.bf16 %v526_v6, %v525_v4  ;;  %v625_v8 = vld [vmem:[#allocation13] sm:$0xff]  ;;  %v522_v10 = vld [vmem:[%s429_s29] sm:$0xff]  ;;  %v705_v17 = vld [vmem:[#allocation15 + $0x8] sm:$0xff]  ;;  %vm793_vm3 = vcmask 130048   ;;  %s2335_s11 = smov 96   ;;  %s2336_s18 = smov 112  }
  0xd1   : > { %1923 = vmatpush3.bf16.msra.mxu1 %v1922_v5  ;;  %v1928_v11 = vpack.c.bf16 %v626_v9, %v625_v8  ;;  %v627_v12 = vld [vmem:[#allocation13 + $0x10] sm:$0xff]  ;;  %v628_v13 = vld [vmem:[#allocation13 + $0x18] sm:$0xff]  ;;  %v624_v15 = vld [vmem:[%s438_s23] sm:$0xff]  ;;  %s2337_s13 = smov 80   ;;  %p514_p10 = scmp.lt.s32.totalorder %s2419_s17, 1  ;;  %vm872_vm4 = vcmask 64512  }
  0xd2   : > { %1924 = vmatprep.subr.bf16.mxu1 %v2332_v0  ;;  %v1931_v14 = vpack.c.bf16 %v628_v13, %v627_v12  ;;  %v704_v16 = vld [vmem:[#allocation15] sm:$0xff]  ;;  %v706_v18 = vld [vmem:[#allocation15 + $0x10] sm:$0xff]  ;;  %v707_v20 = vld [vmem:[#allocation15 + $0x18] sm:$0xff]  ;;  %s2946_s23 = sld [smem:[#allocation31_spill]]  ;;  %s2338_s19 = smov 64   ;;  %vm1476_vm5 = vcmask 392192  }
  0xd3   : > { %v1934_v19 = vpack.c.bf16 %v705_v17, %v704_v16  ;;  %v1937_v21 = vpack.c.bf16 %v707_v20, %v706_v18  ;;  %v703_v22 = vld [vmem:[%s447_s26] sm:$0xff]  ;;  %s515_s6 = scalar_select %p514_p10, %s2419_s17, 1 }
  0xd4   : > { %s2947_s10 = sld [smem:[#allocation33_spill]]  ;;  %s2948_s27 = sld [smem:[#allocation29_spill]] }
  0xd5   : > { %1926 = vmatpush3.bf16.msra.mxu1 %v1925_v7  ;;  %1935 = vmatpush3.bf16.msra.mxu0 %v1934_v19  ;;  %s1788_s24 = sshll.u32 %s515_s6, 5  ;;  %s516_s29 = scalar_lea.vmem %s2878_s3, %s515_s6 }
  0xd6   : > { %1927 = vmatprep.subr.bf16.mxu1 %v2332_v0  ;;  %1936 = vmatprep.subr.bf16.mxu0 %v2332_v0  ;;  %v1767_v38 = vld [vmem:[%s516_s29] ss:$0 sm:$0xff]  ;;  %s1785_s30 = sshll.u32 %s2419_s17, 7  ;;  %s513_s20 = scalar_lea.vmem [#allocation18], %s2658_s25 }
  0xd7   : > { %s1577_s4 = sshll.u32 %s513_s20, 4  ;;  %s2342_s17 = smov [#allocation18]   ;;  %s2832_s4 = int_to_ptr.vmem [resolvable:$true] %s1577_s4 }
  0xd8   : > { %1838 = vmatmul.mubr.msk.f32.vlgmr.msra.gmra.mrb[0].mxu1 %vm527_vm1, %v522_v10  ;;  %s521_s26 = scalar_lea.vmem %s2946_s23, %s1788_s24  ;;  %s2339_s23 = smov 16  }
  0xd9   : > { %1929 = vmatpush3.bf16.msra.mxu1 %v1928_v11  ;;  %1848 = vmatprep.mubr.msk.f32.mxu1 %vm2333_vm0, %v2334_v1  ;;  %v870_v40 = vld [vmem:[%s521_s26] sm:$0xff]  ;;  %v1773_v46 = vld [vmem:[%s521_s26 + $0x8] sm:$0xff]  ;;  %v1777_v51 = vld [vmem:[%s521_s26 + $0x10] sm:$0xff]  ;;  %s2244_s6 = scalar_lea.vmem %s2832_s4, 128  ;;  %s2248_s25 = sshll.u32 %s2342_s17, 4  ;;  %s2249_s25 = int_to_ptr.vmem [resolvable:$false] %s2248_s25 }
  0xda   : > { %1930 = vmatprep.subr.bf16.mxu1 %v2332_v0  ;;  %1938 = vmatpush3.bf16.msra.mxu0 %v1937_v21  ;;  %v1781_v57 = vld [vmem:[%s521_s26 + $0x18] sm:$0xff]  ;;  %s2340_s26 = smov 32   ;;  %p2245_p0 = scmp.ne.s32.totalorder %s2832_s4, %s2244_s6 }
  0xdb   : > { %1872 = vmatprep.subr.mxu0 %v2334_v1  ;;  %v1763_v21 = vld [vmem:[#allocation16] ss:$0 sm:$0xff]  ;;  %p2950_p4 = scmp.ne.s32.totalorder %s2948_s27, 0  ;;  %s2250_s24 = scalar_lea.vmem %s2249_s25, 256 }
  0xdc   : > { %p2251_p7 = scmp.lt.s32.totalorder %s2832_s4, %s2249_s25  ;;  %p2252_p3 = scmp.lt.s32.totalorder %s2250_s24, %s2244_s6 }
  0xdd   : > { %1932 = vmatpush3.bf16.msra.mxu1 %v1931_v14  ;;  %1860 = vmatmul.mubr.msk.f32.vlgmr.msra.gmra.mrb[0].mxu0 %vm527_vm1, %v703_v22  ;;  %p2246_p9 = pnand %p2245_p0, %p2950_p4 }
  0xde   : > { %1862 = vmatprep.subr.mxu1 %v2334_v1  ;;  %1874 = vmatprep.mubr.msk.f32.mxu0 %vm2333_vm0, %v2334_v1  ;;  %p2253_p5 = por %p2252_p3, %p2251_p7 }
  0xdf   : > { %p2247_p13 = pneg %p2246_p9 }
  0xe0   : > { %1849 = vmatmul.mubr.msk.f32.vlgmr.msra.gmra.mrb[2].mxu1 %vm527_vm1, %v624_v15 }
  0xe1   : > { %1864 = vmatprep.mubr.msk.f32.mxu1 %vm2333_vm0, %v2334_v1  ;;  %p2254_p2 = pnand %p2253_p5, %p2247_p13 }
 0x1ab   : > { %v2720_v23 = vpop.f32.mrb[0].mxu1 }
 0x1ac   : > { %602 = vst.msk [vmem:[#allocation2] sm:$0xff] %vm601_vm2, %v2720_v23  ;;  %v1839_v24 = vpop.f32.mrb[1].mxu1 }
 0x1b0   : > { %v777_v29 = vpop.f32.mrb[0].mxu0 }
 0x1b1   : > { %781 = vst.msk [vmem:[#allocation4] sm:$0xff] %vm601_vm2, %v777_v29  ;;  %v1861_v30 = vpop.f32.mrb[1].mxu0 }
 0x1b3   : > { %v698_v25 = vpop.f32.mrb[2].mxu1  ;;  %v782_v28 = vld [vmem:[#allocation2] sm:$0xff] }
 0x1b4   : > { %702 = vst.msk [vmem:[#allocation3] sm:$0xff] %vm601_vm2, %v698_v25  ;;  %v1850_v26 = vpop.f32.mrb[3].mxu1 }
 0x1b8   : > { %v2754_v37 = vld [vmem:[#allocation4] sm:$0xff] }
 0x1bb   : > { %v783_v27 = vld [vmem:[#allocation3] sm:$0xff] }
 0x1bc   : > { %1128 = vrot.lane.b32.xlu1 %v783_v27, %s2335_s11  ;;  %959 = vrot.lane.b32.xlu0 %v783_v27, %s2336_s18 }
 0x1bd   : > { %1863 = vmatpush3.xpose.msk.msra.mxu1 %vm793_vm3, %v783_v27 }
 0x1be   : > { %1867 = vmatprep.subr.mxu1 %v2334_v1 }
 0x1c0   : > { %1865 = vmatmul.mubr.msk.f32.vlgmr.msra.gmra.mrb[4].mxu1 %vm793_vm3, %v782_v28  ;;  %1126 = vrot.lane.b32.xlu1 %v782_v28, %s2335_s11 }
 0x1c1   : > { %957 = vrot.lane.b32.xlu0 %v782_v28, %s2336_s18  ;;  %1869 = vmatprep.mubr.msk.f32.mxu1 %vm2333_vm0, %v2334_v1 }
 0x1c2   : > { %1868 = vmatpush3.msra.mxu1 %v2754_v37 }
 0x1c3   : > { %1877 = vmatprep.subr.mxu1 %v2334_v1 }
 0x1c4   : > { %1294 = vrot.lane.b32.xlu1 %v782_v28, %s2337_s13 }
 0x1c5   : > { %1296 = vrot.lane.b32.xlu0 %v783_v27, %s2337_s13 }
 0x22e   : > { %v960_v31 = vpop.permute.xlu0 %959  ;;  %v1129_v32 = vpop.permute.xlu1 %1128 }
 0x22f   : > { %1873 = vmatpush3.xpose.msk.msra.mxu0 %vm793_vm3, %v960_v31 }
 0x230   : > { %1882 = vmatprep.subr.mxu0 %v2334_v1 }
 0x232   : > { %v1127_v34 = vpop.permute.xlu1 %1126 }
 0x233   : > { %v958_v33 = vpop.permute.xlu0 %957 }
 0x234   : > { %1875 = vmatmul.mubr.msk.f32.vlgmr.msra.gmra.mrb[2].mxu0 %vm793_vm3, %v958_v33 }
 0x235   : > { %1883 = vmatpush3.xpose.msk.msra.mxu0 %vm793_vm3, %v1129_v32  ;;  %1884 = vmatprep.mubr.msk.f32.mxu0 %vm2333_vm0, %v2334_v1 }
 0x236   : > { %1892 = vmatprep.subr.mxu0 %v2334_v1  ;;  %v1295_v36 = vpop.permute.xlu1 %1294 }
 0x237   : > { %v1297_v35 = vpop.permute.xlu0 %1296 }
 0x238   : > { %1885 = vmatmul.mubr.msk.f32.vlgmr.msra.gmra.mrb[4].mxu0 %vm793_vm3, %v1127_v34 }
 0x239   : > { %1893 = vmatpush3.xpose.msk.msra.mxu0 %vm793_vm3, %v1297_v35  ;;  %1894 = vmatprep.mubr.msk.f32.mxu0 %vm2333_vm0, %v2334_v1 }
 0x23a   : > { %1939 = vmatprep.subr.bf16.mxu0 %v2332_v0 }
 0x23c   : > { %1895 = vmatmul.mubr.msk.f32.vlgmr.msra.gmra.mrb[6].mxu0 %vm793_vm3, %v1295_v36 }
 0x23d   : > { %1918 = vmatprep.mubr.msk.f32.mxu0 %vm2333_vm0, %v2334_v1 }
 0x293   : > { %v866_v39 = vpop.f32.mrb[4].mxu1 }
 0x294   : > { %v867_v41 = vadd.f32 %v1767_v38, %v866_v39  ;;  %v1866_v42 = vpop.f32.mrb[5].mxu1 }
 0x296   : > { %v871_v43 = vadd.f32 %v870_v40, %v867_v41 }
 0x298   : > { %v873_v44 = vsel %vm872_vm4, %v871_v43, -inf }
 0x299   : > { %874 = vmax.xlane.f32.xlu0 %v873_v44 }
 0x307   : > { %v1031_v45 = vpop.f32.mrb[2].mxu0 }
 0x308   : > { %v1032_v47 = vadd.f32 %v1767_v38, %v1031_v45  ;;  %v1876_v48 = vpop.f32.mrb[3].mxu0 }
 0x309   : > { %v1483_v48 = vld [vmem:[%s2947_s10 + $0x10] sm:$0xff] }
 0x30a   : > { %v1037_v49 = vadd.f32 %v1773_v46, %v1032_v47  ;;  %v1481_v46 = vld [vmem:[%s2947_s10] sm:$0xff] }
 0x30b   : > { %v1200_v50 = vpop.f32.mrb[4].mxu0 }
 0x30c   : > { %v1201_v52 = vadd.f32 %v1767_v38, %v1200_v50  ;;  %v1886_v53 = vpop.f32.mrb[5].mxu0  ;;  %v1038_v54 = vsel %vm872_vm4, %v1037_v49, -inf }
 0x30d   : > { %1039 = vmax.xlane.f32.xlu1 %v1038_v54  ;;  %v1487_v54 = vld [vmem:[%s2947_s10 + $0x30] sm:$0xff] }
 0x30e   : > { %v1206_v55 = vadd.f32 %v1777_v51, %v1201_v52  ;;  %v1485_v51 = vld [vmem:[%s2947_s10 + $0x20] sm:$0xff]  ;;  %v1486_v52 = vld [vmem:[%s2947_s10 + $0x28] sm:$0xff] }
 0x30f   : > { %v1368_v56 = vpop.f32.mrb[6].mxu0  ;;  %v1946_v53 = vpack.c.bf16 %v1486_v52, %v1485_v51 }
 0x310   : > { %v1369_v58 = vadd.f32 %v1767_v38, %v1368_v56  ;;  %v1896_v59 = vpop.f32.mrb[7].mxu0  ;;  %v1207_v60 = vsel %vm872_vm4, %v1206_v55, -inf }
 0x311   : > { %1208 = vmax.xlane.f32.xlu0 %v1207_v60 }
 0x312   : > { %v1374_v61 = vadd.f32 %v1781_v57, %v1369_v58 }
 0x314   : > { %v1375_v62 = vsel %vm872_vm4, %v1374_v61, -inf }
 0x315   : > { %1376 = vmax.xlane.f32.xlu0 %v1375_v62 }
 0x31e   : > { %1050 = vrot.lane.b32.xlu1 %v2754_v37, %s2336_s18 }
 0x326   : > { %v875_v63 = vpop.xlane.xlu0 %874 }
 0x327   : > { %v876_v2 = vsub.f32 %v871_v43, %v875_v63 }
 0x329   : > { %v877_v3 = vmul.f32 1.442695, %v876_v2 }
 0x32b   : > { %2050 = vpow2.f32 %v877_v3 }
 0x335   : > { %v2051_v4 = vpop.eup %2050 }
 0x336   : > { %v879_v5 = vsel %vm872_vm4, %v2051_v4, 0.0 }
 0x342   : > { %880 = vadd.xlane.f32.xlu1 %v879_v5 }
 0x39a   : > { %v1040_v6 = vpop.xlane.xlu1 %1039 }
 0x39b   : > { %v1041_v7 = vsub.f32 %v1037_v49, %v1040_v6  ;;  %v1484_v49 = vld [vmem:[%s2947_s10 + $0x18] sm:$0xff] }
 0x39c   : > { %v1943_v50 = vpack.c.bf16 %v1484_v49, %v1483_v48 }
 0x39d   : > { %v1042_v8 = vmul.f32 1.442695, %v1041_v7 }
 0x39e   : > { %v1209_v9 = vpop.xlane.xlu0 %1208  ;;  %v1051_v22 = vpop.permute.xlu1 %1050 }
 0x39f   : > { %2052 = vpow2.f32 %v1042_v8  ;;  %v1210_v10 = vsub.f32 %v1206_v55, %v1209_v9  ;;  %v1488_v55 = vld [vmem:[%s2947_s10 + $0x38] sm:$0xff] }
 0x3a0   : > { %v1949_v58 = vpack.c.bf16 %v1488_v55, %v1487_v54 }
 0x3a1   : > { %v1211_v11 = vmul.f32 1.442695, %v1210_v10 }
 0x3a2   : > { %v1377_v12 = vpop.xlane.xlu0 %1376 }
 0x3a3   : > { %2054 = vpow2.f32 %v1211_v11  ;;  %v1378_v13 = vsub.f32 %v1374_v61, %v1377_v12 }
 0x3a5   : > { %v1379_v14 = vmul.f32 1.442695, %v1378_v13 }
 0x3a7   : > { %2056 = vpow2.f32 %v1379_v14 }
 0x3a9   : > { %v2053_v15 = vpop.eup %2052 }
 0x3aa   : > { %v1044_v16 = vsel %vm872_vm4, %v2053_v15, 0.0 }
 0x3ab   : > { %1045 = vadd.xlane.f32.xlu0 %v1044_v16 }
 0x3ad   : > { %v2055_v17 = vpop.eup %2054 }
 0x3ae   : > { %v1213_v18 = vsel %vm872_vm4, %v2055_v17, 0.0 }
 0x3af   : > { %1214 = vadd.xlane.f32.xlu1 %v1213_v18 }
 0x3b1   : > { %v2057_v19 = vpop.eup %2056 }
 0x3b2   : > { %v1381_v20 = vsel %vm872_vm4, %v2057_v19, 0.0 }
 0x3b3   : > { %1382 = vadd.xlane.f32.xlu0 %v1381_v20 }
 0x3c0   : > { %1386 = vrot.lane.b32.xlu1 %v2754_v37, %s2337_s13  ;;  %s1564_s13 = scalar_lea.sflag [#allocation9], %s2655_s12 }
 0x3c4   : > { %609 = vrot.lane.b32.xlu1 %v1763_v21, %s2338_s19 }
 0x3c9   : > { %1218 = vrot.lane.b32.xlu0 %v2754_v37, %s2335_s11  ;;  %s2949_s11 = sld [smem:[#allocation34_spill]] }
 0x3cf   : > { %v881_v24 = vpop.xlane.xlu1 %880  ;;  %s2830_s18 = scalar_lea.hbm %s2949_s11, %s1785_s30 }
 0x3d0   : > { %2058 = vrcp.f32 %v881_v24 }
 0x3da   : > { %v2059_v25 = vpop.eup %2058 }
 0x3db   : > { %v883_v26 = vmul.f32 %v2059_v25, %v2051_v4 }
 0x3dd   : > { %1870 = vmatmul.mubr.msk.f32.vlgmr.msra.gmra.mrb[6].mxu1 %vm872_vm4, %v883_v26 }
 0x3de   : > { %1878 = vmatpush3.msra.mxu1 %v1051_v22  ;;  %1879 = vmatprep.mubr.msk.f32.mxu1 %vm2333_vm0, %v2334_v1 }
 0x3df   : > { %1887 = vmatprep.subr.mxu1 %v2334_v1 }
 0x438   : > { %v1046_v27 = vpop.xlane.xlu0 %1045 }
 0x439   : > { %2060 = vrcp.f32 %v1046_v27 }
 0x43c   : > { %v1215_v28 = vpop.xlane.xlu1 %1214 }
 0x43d   : > { %2062 = vrcp.f32 %v1215_v28 }
 0x440   : > { %v1387_v29 = vpop.permute.xlu1 %1386  ;;  %v1383_v30 = vpop.xlane.xlu0 %1382 }
 0x441   : > { %2064 = vrcp.f32 %v1383_v30 }
 0x443   : > { %v2061_v31 = vpop.eup %2060 }
 0x444   : > { %v1048_v32 = vmul.f32 %v2061_v31, %v2053_v15  ;;  %v610_v33 = vpop.permute.xlu1 %609  ;;  %v1219_v34 = vpop.permute.xlu0 %1218 }
 0x445   : > { %v612_v35 = vadd.f32 %v610_v33, %v2720_v23 }
 0x446   : > { %1880 = vmatmul.mubr.msk.f32.vlgmr.msra.gmra.mrb[8].mxu1 %vm872_vm4, %v1048_v32 }
 0x447   : > { %v2063_v36 = vpop.eup %2062  ;;  %v1764_v37 = vmul.f32 -1.442695, %v612_v35  ;;  %1888 = vmatpush3.msra.mxu1 %v1219_v34  ;;  %1889 = vmatprep.mubr.msk.f32.mxu1 %vm2333_vm0, %v2334_v1 }
 0x448   : > { %v1217_v38 = vmul.f32 %v2063_v36, %v2055_v17  ;;  %1897 = vmatprep.subr.mxu1 %v2334_v1 }
 0x449   : > { %2066 = vpow2.f32 %v1764_v37 }
 0x44a   : > { %1890 = vmatmul.mubr.msk.f32.vlgmr.msra.gmra.mrb[10].mxu1 %vm872_vm4, %v1217_v38 }
 0x44b   : > { %v2065_v39 = vpop.eup %2064  ;;  %1898 = vmatpush3.msra.mxu1 %v1387_v29  ;;  %1899 = vmatprep.mubr.msk.f32.mxu1 %vm2333_vm0, %v2334_v1  ;;  %v1482_v1 = vld [vmem:[%s2947_s10 + $0x8] sm:$0xff] }
 0x44c   : > { %v1385_v23 = vmul.f32 %v2065_v39, %v2057_v19  ;;  %v1940_v47 = vpack.c.bf16 %v1482_v1, %v1481_v46 }
 0x44e   : > { %1900 = vmatmul.mubr.msk.f32.vlgmr.msra.gmra.mrb[12].mxu1 %vm872_vm4, %v1385_v23  ;;  %1941 = vmatpush3.bf16.msra.mxu0 %v1940_v47 }
 0x44f   : > { %1942 = vmatprep.subr.bf16.mxu0 %v2332_v0 }
 0x452   : > { %1944 = vmatpush3.bf16.msra.mxu0 %v1943_v50 }
 0x453   : > { %v2067_v40 = vpop.eup %2066  ;;  %1945 = vmatprep.subr.bf16.mxu0 %v2332_v0 }
 0x454   : > { %v616_v41 = vadd.f32 1.0, %v2067_v40 }
 0x456   : > { %2068 = vrcp.f32 %v616_v41  ;;  %1947 = vmatpush3.bf16.msra.mxu0 %v1946_v53 }
 0x457   : > { %1948 = vmatprep.subr.bf16.mxu0 %v2332_v0 }
 0x45a   : > { %1950 = vmatpush3.bf16.msra.mxu0 %v1949_v58 }
 0x460   : > { %v2069_v42 = vpop.eup %2068 }
 0x461   : > { %620 = vrot.lane.b32.xlu0 %v2069_v42, %s2338_s19  ;;  %s2341_s19 = smov 48  }
 0x4b0   : > { %v953_v43 = vpop.f32.mrb[6].mxu1 }
 0x4b1   : > { %v1871_v44 = vpop.f32.mrb[7].mxu1 }
 0x4d3   : > { %v621_v45 = vpop.permute.xlu0 %620 }
 0x4d4   : > { %623 = vst.msk [vmem:[#allocation5] sm:$0xff] %vm601_vm2, %v621_v45 }
 0x4db   : > { %v785_v5 = vld [vmem:[#allocation5] sm:$0xff] }
 0x519   : > { %v1122_v56 = vpop.f32.mrb[8].mxu1 }
 0x51a   : > { %1463 = vrot.lane.b32.xlu1 %v1122_v56, %s2339_s23  ;;  %v1881_v57 = vpop.f32.mrb[9].mxu1 }
 0x51d   : > { %v1290_v59 = vpop.f32.mrb[10].mxu1 }
 0x51e   : > { %1467 = vrot.lane.b32.xlu0 %v1290_v59, %s2340_s26  ;;  %v1891_v60 = vpop.f32.mrb[11].mxu1 }
 0x521   : > { %v1458_v61 = vpop.f32.mrb[12].mxu1 }
 0x522   : > { %1471 = vrot.lane.b32.xlu1 %v1458_v61, %s2341_s19  ;;  %v1901_v62 = vpop.f32.mrb[13].mxu1 }
 0x58c   : > { %v1464_v63 = vpop.permute.xlu1 %1463 }
 0x58d   : > { %v1474_v3 = vsel %vm793_vm3, %v953_v43, %v1464_v63 }
 0x590   : > { %v1468_v2 = vpop.permute.xlu0 %1467 }
 0x591   : > { %v1475_v4 = vsel %vm527_vm1, %v1474_v3, %v1468_v2 }
 0x594   : > { %v1472_v0 = vpop.permute.xlu1 %1471 }
 0x595   : > { %v1477_v6 = vsel %vm1476_vm5, %v1475_v4, %v1472_v0 }
 0x596   : > { %v1478_v7 = vmul.f32 %v1477_v6, %v785_v5 }
 0x598   : > { %1479 = vst.msk [vmem:[#allocation6] sm:$0xff] %vm601_vm2, %v1478_v7 }
 0x59f   : > { %v1480_v8 = vld [vmem:[#allocation6] sm:$0xff] }
 0x5a0   : > { %1919 = vmatmul.mubr.msk.f32.vlgmr.msra.gmra.mrb[8].mxu0 %vm601_vm2, %v1480_v8 }
 0x673   : > { %v1558_v9 = vpop.f32.mrb[8].mxu0 }
 0x674   : > { %1562 = vst.msk [vmem:[%s513_s20] sm:$0xff] %vm527_vm1, %v1558_v9  ;;  %v1920_v10 = vpop.f32.mrb[9].mxu0 }
 0x675   : > { %2257 = shalt.err (!%p2254_p2)
}
 0x676   : > { %s2258_s12 = scalar_lea.hbm %s2830_s18, 128  ;;  %s2262_s29 = scalar_lea.hbm %s2949_s11, 256 }
 0x677   : > { %p2259_p8 = scmp.ne.s32.totalorder %s2830_s18, %s2258_s12  ;;  %p2263_p1 = scmp.lt.u32.totalorder %s2830_s18, %s2949_s11 }
 0x678   : > { %p2264_p6 = scmp.lt.u32.totalorder %s2262_s29, %s2258_s12  ;;  %p2266_p0 = scmp.lt.u32.totalorder %s2258_s12, %s2830_s18 }
 0x679   : > { %p2260_p11 = pnand %p2259_p8, %p2950_p4 }
 0x67a   : > { %p2265_p10 = por %p2264_p6, %p2263_p1 }
 0x67b   : > { %p2261_p12 = pneg %p2260_p11 }
 0x67c   : > { %p2267_p9 = por %p2266_p0, %p2265_p10 }
 0x67e   : > { %p2268_p13 = pnand %p2267_p9, %p2261_p12 }
 0x680   : > { %2271 = shalt.err (!%p2268_p13)
}
 0x681   : > { %1969 = dma.vmem_to_hbm [thread:$0]  (%p2950_p4), %s2832_s4, 128, %s2830_s18, %s1564_s13  }
 0x682 PF: > { %s2951_s23 = sld [smem:[#allocation24_spill]]  ;;  %s2952_s26 = sld [smem:[#allocation26_spill]] }
 0x683   : > { %s2953_s19 = sld [smem:[#allocation25_spill]] }
 0x688   : > { %s1589_s30 = sand.u32 1, %s2951_s23   ;;  %p2954_p7 = scmp.ne.s32.totalorder %s2952_s26, 0 }
 0x689   : > { %p2955_p3 = scmp.ge.s32.totalorder %s2953_s19, 2  ;;  %s1590_s20 = scalar_lea.sflag [#allocation9], %s1589_s30 }
 0x68b   : > { %p1992_p5 = pnand %p2955_p3, %p2954_p7 }
 0x68d   : > { %2305 = dma.done.wait (!%p1992_p5), %s1590_s20, 128  }
 0x68e   : > { %2307 = vsyncadd (!%p1992_p5), %s1590_s20, 4294967168  ;;  %s2956_s16 = sld [smem:[#allocation27_spill]]  ;;  %s2957_s22 = sld [smem:[#allocation28_spill]] }
 0x68f   : > { %s2958_s13 = smov %s2314_s14  ;;  %s2959_s14 = smov %s2318_s15 }
 0x694   : > { %p28_p2 = scmp.ge.s32.totalorder %s2956_s16, 4   ;;  %s2960_s15 = smov %s2957_s22 }
 0x696   :  { %30 = sbr.rel (!%p28_p2) target bundleno = 15 (0xf), region = 150 }
 0x69d   :  { %1595 = vsyncpa [#allocation8], 1 }
 0x69e   :  { %1597 = vsyncpa [#allocation8 + $0x1], 1 }
 0x69f   :  { %1598 = vsyncpa [#allocation11], 1 }
 0x6a0   :  { %1600 = vsyncpa [#allocation11 + $0x1], 1 }
 0x6a1   :  { %1601 = vsyncpa [#allocation14], 1 }
 0x6a2   :  { %1602 = vsyncpa [#allocation17], 1 }
 0x6a3   :  { %1603 = vsyncpa [#allocation9], 1 }
 0x6a4   :  { %1605 = vsyncpa [#allocation9 + $0x1], 1 }

</bundles_post_ra>
